<compile_context>
chip_gen: v6e
topology: v6e:2x2x1
jax: 0.10.0
libtpu: 0.0.40
codegen_flags: <defaults>
</compile_context>

<pallas_src>
import functools

import jax
import jax.numpy as jnp
from jax.experimental import pallas as pl
from jax.experimental.pallas import tpu as pltpu


def _mlp_kernel(x_ref,
                w0_ref, b0_ref,
                w1_ref, b1_ref,
                w2_ref, b2_ref,
                w3_ref, b3_ref,
                w4_ref, b4_ref,
                w5_ref, b5_ref,
                o_ref,
                *, n_chunks):
    """Fused forward pass for one batch tile (n_chunks chunks of 128 points).

    x_ref:  (n_chunks, 1, C)   input tile, batch in the lane axis (C = 128)
    w0:     (NN, 1)   b0: (NN, 1)     -- Linear(1, NN)
    w1..w4: (NN, NN)  b1..b4: (NN, 1) -- Linear(NN, NN)
    w5:     (NN, 1)   b5: (1, 1)      -- Linear(NN, 1) weight pre-transposed
    o_ref:  (n_chunks, 1, C)   output tile
    """
    # Hoist all weight / bias loads out of the chunk loop (no per-chunk re-reads,
    # no per-chunk re-broadcasts of the same ref data).
    w0 = w0_ref[...]
    b0 = b0_ref[...]
    w1 = w1_ref[...]
    b1 = b1_ref[...]
    w2 = w2_ref[...]
    b2 = b2_ref[...]
    w3 = w3_ref[...]
    b3 = b3_ref[...]
    w4 = w4_ref[...]
    b4 = b4_ref[...]
    w5 = w5_ref[...]
    b5 = b5_ref[...]

    def chunk_body(c, carry):
        x = x_ref[c]                                   # (1, C) -- lane-dense chunk

        # Layer 0: contraction length K=1 -> pure VPU broadcast multiply-add.
        h = jnp.tanh(w0 * x + b0)                      # (NN, C)

        # Hidden layers: MXU matmuls with lane-dense N=C result.
        h = jnp.tanh(jnp.dot(w1, h, preferred_element_type=jnp.float32) + b1)
        h = jnp.tanh(jnp.dot(w2, h, preferred_element_type=jnp.float32) + b2)
        h = jnp.tanh(jnp.dot(w3, h, preferred_element_type=jnp.float32) + b3)
        h = jnp.tanh(jnp.dot(w4, h, preferred_element_type=jnp.float32) + b4)

        # Output layer: N=1 -> VPU multiply + cross-sublane (XLU) reduction.
        out = jnp.sum(w5 * h, axis=0, keepdims=True) + b5   # (1, C)

        o_ref[c] = out.astype(o_ref.dtype)
        return carry

    # Short, static trip count -> fully unrolled so the LLO scheduler can overlap
    # chunk k's tanh (EUP slot) with chunk k+1's matmul pushes (vector-extended slot).
    jax.lax.fori_loop(0, n_chunks, chunk_body, 0, unroll=True)


@functools.partial(jax.jit, static_argnames=("chunk", "chunks_per_tile"))
def pinn_net_forward(x, params, *, chunk=128, chunks_per_tile=4):
    """Run the fused PINN MLP.

    x: (B, 1) float32; B must be a multiple of chunk * chunks_per_tile.
    Returns (B, 1) float32, matching Net(NN).forward semantics.
    """
    B, one = x.shape
    assert one == 1
    tile_b = chunk * chunks_per_tile
    assert B % tile_b == 0, "batch must be a multiple of chunk * chunks_per_tile"

    (w0, b0, w1, b1, w2, b2, w3, b3, w4, b4, w5t, b5) = params
    NN = w0.shape[0]

    n_rows = B // chunk
    # Put the batch in the lane axis: each "row" is a 128-point lane-dense chunk.
    x_rows = x.reshape(n_rows, 1, chunk)

    grid = (B // tile_b,)

    row_spec = pl.BlockSpec((chunks_per_tile, 1, chunk), lambda i: (i, 0, 0))

    def full_spec(shape):
        return pl.BlockSpec(shape, lambda i: (0, 0))

    in_specs = [
        row_spec,                                      # x
        full_spec((NN, 1)), full_spec((NN, 1)),        # w0, b0
        full_spec((NN, NN)), full_spec((NN, 1)),       # w1, b1
        full_spec((NN, NN)), full_spec((NN, 1)),       # w2, b2
        full_spec((NN, NN)), full_spec((NN, 1)),       # w3, b3
        full_spec((NN, NN)), full_spec((NN, 1)),       # w4, b4
        full_spec((NN, 1)), full_spec((1, 1)),         # w5 (pre-transposed), b5
    ]

    kernel = functools.partial(_mlp_kernel, n_chunks=chunks_per_tile)

    out_rows = pl.pallas_call(
        kernel,
        out_shape=jax.ShapeDtypeStruct((n_rows, 1, chunk), x.dtype),
        grid_spec=pltpu.PrefetchScalarGridSpec(
            num_scalar_prefetch=0,
            grid=grid,
            in_specs=in_specs,
            out_specs=row_spec,
        ),
        compiler_params=pltpu.CompilerParams(
            dimension_semantics=("parallel",)),
    )(x_rows, w0, b0, w1, b1, w2, b2, w3, b3, w4, b4, w5t, b5)

    return out_rows.reshape(B, 1)


def init_params(key, NN):
    """Deterministic init matching the layer shapes of Net(NN).

    Layers 0..4: weight (out_features, in_features) == PyTorch layout, bias (out, 1).
    Layer 5:     weight stored pre-transposed as (NN, 1), bias (1, 1).
    Scale matches torch.nn.Linear default U(-1/sqrt(fan_in), 1/sqrt(fan_in)).
    """
    shapes = [(1, NN), (NN, NN), (NN, NN), (NN, NN), (NN, NN), (NN, 1)]
    params = []
    for li, (fan_in, fan_out) in enumerate(shapes):
        key, kw, kb = jax.random.split(key, 3)
        bound = 1.0 / jnp.sqrt(fan_in)
        if li < 5:
            w = jax.random.uniform(kw, (fan_out, fan_in), jnp.float32, -bound, bound)
        else:  # output layer, stored pre-transposed for the in-kernel VPU reduce
            w = jax.random.uniform(kw, (fan_in, fan_out), jnp.float32, -bound, bound)
        b = jax.random.uniform(kb, (fan_out, 1), jnp.float32, -bound, bound)
        params.extend([w, b])
    return tuple(params)


def reference_forward(x, params):
    """Pure-JAX reference of the PyTorch forward pass (y = x @ W.T + b per layer)."""
    (w0, b0, w1, b1, w2, b2, w3, b3, w4, b4, w5t, b5) = params
    h = jnp.tanh(x @ w0.T + b0.T)
    h = jnp.tanh(h @ w1.T + b1.T)
    h = jnp.tanh(h @ w2.T + b2.T)
    h = jnp.tanh(h @ w3.T + b3.T)
    h = jnp.tanh(h @ w4.T + b4.T)
    return h @ w5t + b5.T


if __name__ == "__main__":
    NN = 32               # hidden width of Net(NN)
    CHUNK = 128           # lane width of one inner chunk
    CHUNKS_PER_TILE = 4   # tile_b = 512 points per grid step
    B = 1024              # collocation points; grid = 2 -> both v7x TCs get work

    key = jax.random.PRNGKey(0)
    kx, kp = jax.random.split(key)
    x = jax.random.uniform(kx, (B, 1), jnp.float32, 0.0, 2.0)
    params = init_params(kp, NN)

    out = pinn_net_forward(x, params, chunk=CHUNK, chunks_per_tile=CHUNKS_PER_TILE)
    out = jax.block_until_ready(out)

    ref = reference_forward(x, params)
    assert out.shape == (B, 1)
    max_err = float(jnp.max(jnp.abs(out - ref)))
    assert jnp.allclose(out, ref, atol=1e-5, rtol=1e-5), (
        f"mismatch vs reference, max abs err {max_err}")

    print("KERNEL_OK")
</pallas_src>

<mosaic_0001>
module attributes {stable_mosaic.version = 11 : i64} {
  func.func @_mlp_kernel(%arg0: i32, %arg1: memref<4x1x128xf32, #tpu.memory_space<vmem>>, %arg2: memref<32x1xf32, #tpu.memory_space<vmem>>, %arg3: memref<32x1xf32, #tpu.memory_space<vmem>>, %arg4: memref<32x32xf32, #tpu.memory_space<vmem>>, %arg5: memref<32x1xf32, #tpu.memory_space<vmem>>, %arg6: memref<32x32xf32, #tpu.memory_space<vmem>>, %arg7: memref<32x1xf32, #tpu.memory_space<vmem>>, %arg8: memref<32x32xf32, #tpu.memory_space<vmem>>, %arg9: memref<32x1xf32, #tpu.memory_space<vmem>>, %arg10: memref<32x32xf32, #tpu.memory_space<vmem>>, %arg11: memref<32x1xf32, #tpu.memory_space<vmem>>, %arg12: memref<32x1xf32, #tpu.memory_space<vmem>>, %arg13: memref<1x1xf32, #tpu.memory_space<vmem>>, %arg14: memref<4x1x128xf32, #tpu.memory_space<vmem>>) attributes {dimension_semantics = [#tpu.dimension_semantics<parallel>], iteration_bounds = array<i64: 2>, scalar_prefetch = 0 : i64, scratch_operands = 0 : i64, tpu.core_type = #tpu.core_type<tc>, window_params = [{transform_indices = @transform_0, window_bounds = array<i64: 4, 1, 128>}, {pipeline_mode = #tpu.pipeline_mode<synchronous>, transform_indices = @transform_1, window_bounds = array<i64: 32, 1>}, {pipeline_mode = #tpu.pipeline_mode<synchronous>, transform_indices = @transform_2, window_bounds = array<i64: 32, 1>}, {pipeline_mode = #tpu.pipeline_mode<synchronous>, transform_indices = @transform_3, window_bounds = array<i64: 32, 32>}, {pipeline_mode = #tpu.pipeline_mode<synchronous>, transform_indices = @transform_4, window_bounds = array<i64: 32, 1>}, {pipeline_mode = #tpu.pipeline_mode<synchronous>, transform_indices = @transform_5, window_bounds = array<i64: 32, 32>}, {pipeline_mode = #tpu.pipeline_mode<synchronous>, transform_indices = @transform_6, window_bounds = array<i64: 32, 1>}, {pipeline_mode = #tpu.pipeline_mode<synchronous>, transform_indices = @transform_7, window_bounds = array<i64: 32, 32>}, {pipeline_mode = #tpu.pipeline_mode<synchronous>, transform_indices = @transform_8, window_bounds = array<i64: 32, 1>}, {pipeline_mode = #tpu.pipeline_mode<synchronous>, transform_indices = @transform_9, window_bounds = array<i64: 32, 32>}, {pipeline_mode = #tpu.pipeline_mode<synchronous>, transform_indices = @transform_10, window_bounds = array<i64: 32, 1>}, {pipeline_mode = #tpu.pipeline_mode<synchronous>, transform_indices = @transform_11, window_bounds = array<i64: 32, 1>}, {pipeline_mode = #tpu.pipeline_mode<synchronous>, transform_indices = @transform_12, window_bounds = array<i64: 1, 1>}, {transform_indices = @transform_13, window_bounds = array<i64: 4, 1, 128>}]} {
    %c0 = arith.constant 0 : index
    %c0_0 = arith.constant 0 : index
    %0 = vector.load %arg2[%c0, %c0_0] : memref<32x1xf32, #tpu.memory_space<vmem>>, vector<32x1xf32>
    %c0_1 = arith.constant 0 : index
    %c0_2 = arith.constant 0 : index
    %1 = vector.load %arg3[%c0_1, %c0_2] : memref<32x1xf32, #tpu.memory_space<vmem>>, vector<32x1xf32>
    %c0_3 = arith.constant 0 : index
    %c0_4 = arith.constant 0 : index
    %2 = vector.load %arg4[%c0_3, %c0_4] : memref<32x32xf32, #tpu.memory_space<vmem>>, vector<32x32xf32>
    %c0_5 = arith.constant 0 : index
    %c0_6 = arith.constant 0 : index
    %3 = vector.load %arg5[%c0_5, %c0_6] : memref<32x1xf32, #tpu.memory_space<vmem>>, vector<32x1xf32>
    %c0_7 = arith.constant 0 : index
    %c0_8 = arith.constant 0 : index
    %4 = vector.load %arg6[%c0_7, %c0_8] : memref<32x32xf32, #tpu.memory_space<vmem>>, vector<32x32xf32>
    %c0_9 = arith.constant 0 : index
    %c0_10 = arith.constant 0 : index
    %5 = vector.load %arg7[%c0_9, %c0_10] : memref<32x1xf32, #tpu.memory_space<vmem>>, vector<32x1xf32>
    %c0_11 = arith.constant 0 : index
    %c0_12 = arith.constant 0 : index
    %6 = vector.load %arg8[%c0_11, %c0_12] : memref<32x32xf32, #tpu.memory_space<vmem>>, vector<32x32xf32>
    %c0_13 = arith.constant 0 : index
    %c0_14 = arith.constant 0 : index
    %7 = vector.load %arg9[%c0_13, %c0_14] : memref<32x1xf32, #tpu.memory_space<vmem>>, vector<32x1xf32>
    %c0_15 = arith.constant 0 : index
    %c0_16 = arith.constant 0 : index
    %8 = vector.load %arg10[%c0_15, %c0_16] : memref<32x32xf32, #tpu.memory_space<vmem>>, vector<32x32xf32>
    %c0_17 = arith.constant 0 : index
    %c0_18 = arith.constant 0 : index
    %9 = vector.load %arg11[%c0_17, %c0_18] : memref<32x1xf32, #tpu.memory_space<vmem>>, vector<32x1xf32>
    %c0_19 = arith.constant 0 : index
    %c0_20 = arith.constant 0 : index
    %10 = vector.load %arg12[%c0_19, %c0_20] : memref<32x1xf32, #tpu.memory_space<vmem>>, vector<32x1xf32>
    %c0_21 = arith.constant 0 : index
    %c0_22 = arith.constant 0 : index
    %11 = vector.load %arg13[%c0_21, %c0_22] : memref<1x1xf32, #tpu.memory_space<vmem>>, vector<1x1xf32>
    %c0_i32 = arith.constant 0 : i32
    %12 = arith.index_cast %c0_i32 : i32 to index
    %c0_23 = arith.constant 0 : index
    %c0_24 = arith.constant 0 : index
    %13 = vector.load %arg1[%12, %c0_23, %c0_24] : memref<4x1x128xf32, #tpu.memory_space<vmem>>, vector<1x1x128xf32>
    %14 = vector.shape_cast %13 : vector<1x1x128xf32> to vector<1x128xf32>
    %15 = vector.broadcast %0 : vector<32x1xf32> to vector<32x128xf32>
    %16 = vector.broadcast %14 : vector<1x128xf32> to vector<32x128xf32>
    %17 = arith.mulf %15, %16 : vector<32x128xf32>
    %18 = vector.broadcast %1 : vector<32x1xf32> to vector<32x128xf32>
    %19 = arith.addf %17, %18 : vector<32x128xf32>
    %20 = math.tanh %19 : vector<32x128xf32>
    %cst = arith.constant dense<0.000000e+00> : vector<32x128xf32>
    %21 = tpu.matmul %2, %20, %cst {dimension_numbers = #tpu.dot_dimension_numbers<[1], [0], [0], [1], [0, 0, 1, 1], [], []>} : vector<32x32xf32>, vector<32x128xf32>, vector<32x128xf32> -> vector<32x128xf32>
    %22 = vector.broadcast %3 : vector<32x1xf32> to vector<32x128xf32>
    %23 = arith.addf %21, %22 : vector<32x128xf32>
    %24 = math.tanh %23 : vector<32x128xf32>
    %cst_25 = arith.constant dense<0.000000e+00> : vector<32x128xf32>
    %25 = tpu.matmul %4, %24, %cst_25 {dimension_numbers = #tpu.dot_dimension_numbers<[1], [0], [0], [1], [0, 0, 1, 1], [], []>} : vector<32x32xf32>, vector<32x128xf32>, vector<32x128xf32> -> vector<32x128xf32>
    %26 = vector.broadcast %5 : vector<32x1xf32> to vector<32x128xf32>
    %27 = arith.addf %25, %26 : vector<32x128xf32>
    %28 = math.tanh %27 : vector<32x128xf32>
    %cst_26 = arith.constant dense<0.000000e+00> : vector<32x128xf32>
    %29 = tpu.matmul %6, %28, %cst_26 {dimension_numbers = #tpu.dot_dimension_numbers<[1], [0], [0], [1], [0, 0, 1, 1], [], []>} : vector<32x32xf32>, vector<32x128xf32>, vector<32x128xf32> -> vector<32x128xf32>
    %30 = vector.broadcast %7 : vector<32x1xf32> to vector<32x128xf32>
    %31 = arith.addf %29, %30 : vector<32x128xf32>
    %32 = math.tanh %31 : vector<32x128xf32>
    %cst_27 = arith.constant dense<0.000000e+00> : vector<32x128xf32>
    %33 = tpu.matmul %8, %32, %cst_27 {dimension_numbers = #tpu.dot_dimension_numbers<[1], [0], [0], [1], [0, 0, 1, 1], [], []>} : vector<32x32xf32>, vector<32x128xf32>, vector<32x128xf32> -> vector<32x128xf32>
    %34 = vector.broadcast %9 : vector<32x1xf32> to vector<32x128xf32>
    %35 = arith.addf %33, %34 : vector<32x128xf32>
    %36 = math.tanh %35 : vector<32x128xf32>
    %37 = vector.broadcast %10 : vector<32x1xf32> to vector<32x128xf32>
    %38 = arith.mulf %37, %36 : vector<32x128xf32>
    %cst_28 = arith.constant dense<0.000000e+00> : vector<128xf32>
    %39 = vector.multi_reduction <add>, %38, %cst_28 [0] : vector<32x128xf32> to vector<128xf32>
    %40 = vector.shape_cast %39 : vector<128xf32> to vector<1x128xf32>
    %41 = vector.broadcast %11 : vector<1x1xf32> to vector<1x128xf32>
    %42 = arith.addf %40, %41 : vector<1x128xf32>
    %43 = arith.index_cast %c0_i32 : i32 to index
    %c0_29 = arith.constant 0 : index
    %c0_30 = arith.constant 0 : index
    %44 = vector.load %arg14[%43, %c0_29, %c0_30] : memref<4x1x128xf32, #tpu.memory_space<vmem>>, vector<1x1x128xf32>
    %45 = vector.shape_cast %44 : vector<1x1x128xf32> to vector<1x128xf32>
    %46 = vector.shape_cast %42 : vector<1x128xf32> to vector<1x1x128xf32>
    tpu.vector_store %arg14[%43, %c0_29, %c0_30], %46 {strides = array<i32>} : memref<4x1x128xf32, #tpu.memory_space<vmem>>, vector<1x1x128xf32>,
    %c1_i32 = arith.constant 1 : i32
    %47 = arith.index_cast %c1_i32 : i32 to index
    %c0_31 = arith.constant 0 : index
    %c0_32 = arith.constant 0 : index
    %48 = vector.load %arg1[%47, %c0_31, %c0_32] : memref<4x1x128xf32, #tpu.memory_space<vmem>>, vector<1x1x128xf32>
    %49 = vector.shape_cast %48 : vector<1x1x128xf32> to vector<1x128xf32>
    %50 = vector.broadcast %0 : vector<32x1xf32> to vector<32x128xf32>
    %51 = vector.broadcast %49 : vector<1x128xf32> to vector<32x128xf32>
    %52 = arith.mulf %50, %51 : vector<32x128xf32>
    %53 = vector.broadcast %1 : vector<32x1xf32> to vector<32x128xf32>
    %54 = arith.addf %52, %53 : vector<32x128xf32>
    %55 = math.tanh %54 : vector<32x128xf32>
    %cst_33 = arith.constant dense<0.000000e+00> : vector<32x128xf32>
    %56 = tpu.matmul %2, %55, %cst_33 {dimension_numbers = #tpu.dot_dimension_numbers<[1], [0], [0], [1], [0, 0, 1, 1], [], []>} : vector<32x32xf32>, vector<32x128xf32>, vector<32x128xf32> -> vector<32x128xf32>
    %57 = vector.broadcast %3 : vector<32x1xf32> to vector<32x128xf32>
    %58 = arith.addf %56, %57 : vector<32x128xf32>
    %59 = math.tanh %58 : vector<32x128xf32>
    %cst_34 = arith.constant dense<0.000000e+00> : vector<32x128xf32>
    %60 = tpu.matmul %4, %59, %cst_34 {dimension_numbers = #tpu.dot_dimension_numbers<[1], [0], [0], [1], [0, 0, 1, 1], [], []>} : vector<32x32xf32>, vector<32x128xf32>, vector<32x128xf32> -> vector<32x128xf32>
    %61 = vector.broadcast %5 : vector<32x1xf32> to vector<32x128xf32>
    %62 = arith.addf %60, %61 : vector<32x128xf32>
    %63 = math.tanh %62 : vector<32x128xf32>
    %cst_35 = arith.constant dense<0.000000e+00> : vector<32x128xf32>
    %64 = tpu.matmul %6, %63, %cst_35 {dimension_numbers = #tpu.dot_dimension_numbers<[1], [0], [0], [1], [0, 0, 1, 1], [], []>} : vector<32x32xf32>, vector<32x128xf32>, vector<32x128xf32> -> vector<32x128xf32>
    %65 = vector.broadcast %7 : vector<32x1xf32> to vector<32x128xf32>
    %66 = arith.addf %64, %65 : vector<32x128xf32>
    %67 = math.tanh %66 : vector<32x128xf32>
    %cst_36 = arith.constant dense<0.000000e+00> : vector<32x128xf32>
    %68 = tpu.matmul %8, %67, %cst_36 {dimension_numbers = #tpu.dot_dimension_numbers<[1], [0], [0], [1], [0, 0, 1, 1], [], []>} : vector<32x32xf32>, vector<32x128xf32>, vector<32x128xf32> -> vector<32x128xf32>
    %69 = vector.broadcast %9 : vector<32x1xf32> to vector<32x128xf32>
    %70 = arith.addf %68, %69 : vector<32x128xf32>
    %71 = math.tanh %70 : vector<32x128xf32>
    %72 = vector.broadcast %10 : vector<32x1xf32> to vector<32x128xf32>
    %73 = arith.mulf %72, %71 : vector<32x128xf32>
    %cst_37 = arith.constant dense<0.000000e+00> : vector<128xf32>
    %74 = vector.multi_reduction <add>, %73, %cst_37 [0] : vector<32x128xf32> to vector<128xf32>
    %75 = vector.shape_cast %74 : vector<128xf32> to vector<1x128xf32>
    %76 = vector.broadcast %11 : vector<1x1xf32> to vector<1x128xf32>
    %77 = arith.addf %75, %76 : vector<1x128xf32>
    %78 = arith.index_cast %c1_i32 : i32 to index
    %c0_38 = arith.constant 0 : index
    %c0_39 = arith.constant 0 : index
    %79 = vector.load %arg14[%78, %c0_38, %c0_39] : memref<4x1x128xf32, #tpu.memory_space<vmem>>, vector<1x1x128xf32>
    %80 = vector.shape_cast %79 : vector<1x1x128xf32> to vector<1x128xf32>
    %81 = vector.shape_cast %77 : vector<1x128xf32> to vector<1x1x128xf32>
    tpu.vector_store %arg14[%78, %c0_38, %c0_39], %81 {strides = array<i32>} : memref<4x1x128xf32, #tpu.memory_space<vmem>>, vector<1x1x128xf32>,
    %c2_i32 = arith.constant 2 : i32
    %82 = arith.index_cast %c2_i32 : i32 to index
    %c0_40 = arith.constant 0 : index
    %c0_41 = arith.constant 0 : index
    %83 = vector.load %arg1[%82, %c0_40, %c0_41] : memref<4x1x128xf32, #tpu.memory_space<vmem>>, vector<1x1x128xf32>
    %84 = vector.shape_cast %83 : vector<1x1x128xf32> to vector<1x128xf32>
    %85 = vector.broadcast %0 : vector<32x1xf32> to vector<32x128xf32>
    %86 = vector.broadcast %84 : vector<1x128xf32> to vector<32x128xf32>
    %87 = arith.mulf %85, %86 : vector<32x128xf32>
    %88 = vector.broadcast %1 : vector<32x1xf32> to vector<32x128xf32>
    %89 = arith.addf %87, %88 : vector<32x128xf32>
    %90 = math.tanh %89 : vector<32x128xf32>
    %cst_42 = arith.constant dense<0.000000e+00> : vector<32x128xf32>
    %91 = tpu.matmul %2, %90, %cst_42 {dimension_numbers = #tpu.dot_dimension_numbers<[1], [0], [0], [1], [0, 0, 1, 1], [], []>} : vector<32x32xf32>, vector<32x128xf32>, vector<32x128xf32> -> vector<32x128xf32>
    %92 = vector.broadcast %3 : vector<32x1xf32> to vector<32x128xf32>
    %93 = arith.addf %91, %92 : vector<32x128xf32>
    %94 = math.tanh %93 : vector<32x128xf32>
    %cst_43 = arith.constant dense<0.000000e+00> : vector<32x128xf32>
    %95 = tpu.matmul %4, %94, %cst_43 {dimension_numbers = #tpu.dot_dimension_numbers<[1], [0], [0], [1], [0, 0, 1, 1], [], []>} : vector<32x32xf32>, vector<32x128xf32>, vector<32x128xf32> -> vector<32x128xf32>
    %96 = vector.broadcast %5 : vector<32x1xf32> to vector<32x128xf32>
    %97 = arith.addf %95, %96 : vector<32x128xf32>
    %98 = math.tanh %97 : vector<32x128xf32>
    %cst_44 = arith.constant dense<0.000000e+00> : vector<32x128xf32>
    %99 = tpu.matmul %6, %98, %cst_44 {dimension_numbers = #tpu.dot_dimension_numbers<[1], [0], [0], [1], [0, 0, 1, 1], [], []>} : vector<32x32xf32>, vector<32x128xf32>, vector<32x128xf32> -> vector<32x128xf32>
    %100 = vector.broadcast %7 : vector<32x1xf32> to vector<32x128xf32>
    %101 = arith.addf %99, %100 : vector<32x128xf32>
    %102 = math.tanh %101 : vector<32x128xf32>
    %cst_45 = arith.constant dense<0.000000e+00> : vector<32x128xf32>
    %103 = tpu.matmul %8, %102, %cst_45 {dimension_numbers = #tpu.dot_dimension_numbers<[1], [0], [0], [1], [0, 0, 1, 1], [], []>} : vector<32x32xf32>, vector<32x128xf32>, vector<32x128xf32> -> vector<32x128xf32>
    %104 = vector.broadcast %9 : vector<32x1xf32> to vector<32x128xf32>
    %105 = arith.addf %103, %104 : vector<32x128xf32>
    %106 = math.tanh %105 : vector<32x128xf32>
    %107 = vector.broadcast %10 : vector<32x1xf32> to vector<32x128xf32>
    %108 = arith.mulf %107, %106 : vector<32x128xf32>
    %cst_46 = arith.constant dense<0.000000e+00> : vector<128xf32>
    %109 = vector.multi_reduction <add>, %108, %cst_46 [0] : vector<32x128xf32> to vector<128xf32>
    %110 = vector.shape_cast %109 : vector<128xf32> to vector<1x128xf32>
    %111 = vector.broadcast %11 : vector<1x1xf32> to vector<1x128xf32>
    %112 = arith.addf %110, %111 : vector<1x128xf32>
    %113 = arith.index_cast %c2_i32 : i32 to index
    %c0_47 = arith.constant 0 : index
    %c0_48 = arith.constant 0 : index
    %114 = vector.load %arg14[%113, %c0_47, %c0_48] : memref<4x1x128xf32, #tpu.memory_space<vmem>>, vector<1x1x128xf32>
    %115 = vector.shape_cast %114 : vector<1x1x128xf32> to vector<1x128xf32>
    %116 = vector.shape_cast %112 : vector<1x128xf32> to vector<1x1x128xf32>
    tpu.vector_store %arg14[%113, %c0_47, %c0_48], %116 {strides = array<i32>} : memref<4x1x128xf32, #tpu.memory_space<vmem>>, vector<1x1x128xf32>,
    %c3_i32 = arith.constant 3 : i32
    %117 = arith.index_cast %c3_i32 : i32 to index
    %c0_49 = arith.constant 0 : index
    %c0_50 = arith.constant 0 : index
    %118 = vector.load %arg1[%117, %c0_49, %c0_50] : memref<4x1x128xf32, #tpu.memory_space<vmem>>, vector<1x1x128xf32>
    %119 = vector.shape_cast %118 : vector<1x1x128xf32> to vector<1x128xf32>
    %120 = vector.broadcast %0 : vector<32x1xf32> to vector<32x128xf32>
    %121 = vector.broadcast %119 : vector<1x128xf32> to vector<32x128xf32>
    %122 = arith.mulf %120, %121 : vector<32x128xf32>
    %123 = vector.broadcast %1 : vector<32x1xf32> to vector<32x128xf32>
    %124 = arith.addf %122, %123 : vector<32x128xf32>
    %125 = math.tanh %124 : vector<32x128xf32>
    %cst_51 = arith.constant dense<0.000000e+00> : vector<32x128xf32>
    %126 = tpu.matmul %2, %125, %cst_51 {dimension_numbers = #tpu.dot_dimension_numbers<[1], [0], [0], [1], [0, 0, 1, 1], [], []>} : vector<32x32xf32>, vector<32x128xf32>, vector<32x128xf32> -> vector<32x128xf32>
    %127 = vector.broadcast %3 : vector<32x1xf32> to vector<32x128xf32>
    %128 = arith.addf %126, %127 : vector<32x128xf32>
    %129 = math.tanh %128 : vector<32x128xf32>
    %cst_52 = arith.constant dense<0.000000e+00> : vector<32x128xf32>
    %130 = tpu.matmul %4, %129, %cst_52 {dimension_numbers = #tpu.dot_dimension_numbers<[1], [0], [0], [1], [0, 0, 1, 1], [], []>} : vector<32x32xf32>, vector<32x128xf32>, vector<32x128xf32> -> vector<32x128xf32>
    %131 = vector.broadcast %5 : vector<32x1xf32> to vector<32x128xf32>
    %132 = arith.addf %130, %131 : vector<32x128xf32>
    %133 = math.tanh %132 : vector<32x128xf32>
    %cst_53 = arith.constant dense<0.000000e+00> : vector<32x128xf32>
    %134 = tpu.matmul %6, %133, %cst_53 {dimension_numbers = #tpu.dot_dimension_numbers<[1], [0], [0], [1], [0, 0, 1, 1], [], []>} : vector<32x32xf32>, vector<32x128xf32>, vector<32x128xf32> -> vector<32x128xf32>
    %135 = vector.broadcast %7 : vector<32x1xf32> to vector<32x128xf32>
    %136 = arith.addf %134, %135 : vector<32x128xf32>
    %137 = math.tanh %136 : vector<32x128xf32>
    %cst_54 = arith.constant dense<0.000000e+00> : vector<32x128xf32>
    %138 = tpu.matmul %8, %137, %cst_54 {dimension_numbers = #tpu.dot_dimension_numbers<[1], [0], [0], [1], [0, 0, 1, 1], [], []>} : vector<32x32xf32>, vector<32x128xf32>, vector<32x128xf32> -> vector<32x128xf32>
    %139 = vector.broadcast %9 : vector<32x1xf32> to vector<32x128xf32>
    %140 = arith.addf %138, %139 : vector<32x128xf32>
    %141 = math.tanh %140 : vector<32x128xf32>
    %142 = vector.broadcast %10 : vector<32x1xf32> to vector<32x128xf32>
    %143 = arith.mulf %142, %141 : vector<32x128xf32>
    %cst_55 = arith.constant dense<0.000000e+00> : vector<128xf32>
    %144 = vector.multi_reduction <add>, %143, %cst_55 [0] : vector<32x128xf32> to vector<128xf32>
    %145 = vector.shape_cast %144 : vector<128xf32> to vector<1x128xf32>
    %146 = vector.broadcast %11 : vector<1x1xf32> to vector<1x128xf32>
    %147 = arith.addf %145, %146 : vector<1x128xf32>
    %148 = arith.index_cast %c3_i32 : i32 to index
    %c0_56 = arith.constant 0 : index
    %c0_57 = arith.constant 0 : index
    %149 = vector.load %arg14[%148, %c0_56, %c0_57] : memref<4x1x128xf32, #tpu.memory_space<vmem>>, vector<1x1x128xf32>
    %150 = vector.shape_cast %149 : vector<1x1x128xf32> to vector<1x128xf32>
    %151 = vector.shape_cast %147 : vector<1x128xf32> to vector<1x1x128xf32>
    tpu.vector_store %arg14[%148, %c0_56, %c0_57], %151 {strides = array<i32>} : memref<4x1x128xf32, #tpu.memory_space<vmem>>, vector<1x1x128xf32>,
    %c4_i32 = arith.constant 4 : i32
    return
  }
  func.func @transform_0(%arg0: i32) -> (i32, i32, i32) {
    %c0_i32 = arith.constant 0 : i32
    %c0_i32_0 = arith.constant 0 : i32
    %c0_i32_1 = arith.constant 0 : i32
    return %arg0, %c0_i32, %c0_i32_0 : i32, i32, i32
  }
  func.func @transform_1(%arg0: i32) -> (i32, i32) {
    %c0_i32 = arith.constant 0 : i32
    %c0_i32_0 = arith.constant 0 : i32
    %c0_i32_1 = arith.constant 0 : i32
    return %c0_i32, %c0_i32_0 : i32, i32
  }
  func.func @transform_2(%arg0: i32) -> (i32, i32) {
    %c0_i32 = arith.constant 0 : i32
    %c0_i32_0 = arith.constant 0 : i32
    %c0_i32_1 = arith.constant 0 : i32
    return %c0_i32, %c0_i32_0 : i32, i32
  }
  func.func @transform_3(%arg0: i32) -> (i32, i32) {
    %c0_i32 = arith.constant 0 : i32
    %c0_i32_0 = arith.constant 0 : i32
    %c0_i32_1 = arith.constant 0 : i32
    return %c0_i32, %c0_i32_0 : i32, i32
  }
  func.func @transform_4(%arg0: i32) -> (i32, i32) {
    %c0_i32 = arith.constant 0 : i32
    %c0_i32_0 = arith.constant 0 : i32
    %c0_i32_1 = arith.constant 0 : i32
    return %c0_i32, %c0_i32_0 : i32, i32
  }
  func.func @transform_5(%arg0: i32) -> (i32, i32) {
    %c0_i32 = arith.constant 0 : i32
    %c0_i32_0 = arith.constant 0 : i32
    %c0_i32_1 = arith.constant 0 : i32
    return %c0_i32, %c0_i32_0 : i32, i32
  }
  func.func @transform_6(%arg0: i32) -> (i32, i32) {
    %c0_i32 = arith.constant 0 : i32
    %c0_i32_0 = arith.constant 0 : i32
    %c0_i32_1 = arith.constant 0 : i32
    return %c0_i32, %c0_i32_0 : i32, i32
  }
  func.func @transform_7(%arg0: i32) -> (i32, i32) {
    %c0_i32 = arith.constant 0 : i32
    %c0_i32_0 = arith.constant 0 : i32
    %c0_i32_1 = arith.constant 0 : i32
    return %c0_i32, %c0_i32_0 : i32, i32
  }
  func.func @transform_8(%arg0: i32) -> (i32, i32) {
    %c0_i32 = arith.constant 0 : i32
    %c0_i32_0 = arith.constant 0 : i32
    %c0_i32_1 = arith.constant 0 : i32
    return %c0_i32, %c0_i32_0 : i32, i32
  }
  func.func @transform_9(%arg0: i32) -> (i32, i32) {
    %c0_i32 = arith.constant 0 : i32
    %c0_i32_0 = arith.constant 0 : i32
    %c0_i32_1 = arith.constant 0 : i32
    return %c0_i32, %c0_i32_0 : i32, i32
  }
  func.func @transform_10(%arg0: i32) -> (i32, i32) {
    %c0_i32 = arith.constant 0 : i32
    %c0_i32_0 = arith.constant 0 : i32
    %c0_i32_1 = arith.constant 0 : i32
    return %c0_i32, %c0_i32_0 : i32, i32
  }
  func.func @transform_11(%arg0: i32) -> (i32, i32) {
    %c0_i32 = arith.constant 0 : i32
    %c0_i32_0 = arith.constant 0 : i32
    %c0_i32_1 = arith.constant 0 : i32
    return %c0_i32, %c0_i32_0 : i32, i32
  }
  func.func @transform_12(%arg0: i32) -> (i32, i32) {
    %c0_i32 = arith.constant 0 : i32
    %c0_i32_0 = arith.constant 0 : i32
    %c0_i32_1 = arith.constant 0 : i32
    return %c0_i32, %c0_i32_0 : i32, i32
  }
  func.func @transform_13(%arg0: i32) -> (i32, i32, i32) {
    %c0_i32 = arith.constant 0 : i32
    %c0_i32_0 = arith.constant 0 : i32
    %c0_i32_1 = arith.constant 0 : i32
    return %arg0, %c0_i32, %c0_i32_0 : i32, i32, i32
  }
}

</mosaic_0001>

<bundles_post_ra>
// kernel: pinn_net_forward.1
= control target key start
LH: loop header
LB: loop body
LE: loop exit
PB: predicated region body
PF: predicated region fallthrough
CT: control target
= control target key end

     0   :  { %s3670_s0 = inlined_call_operand.vmem [shape: f32[8,1,128], index: 0, kind: input, shape index: {}]   ;;  %s3671_s1 = inlined_call_operand.vmem [shape: f32[32,1], index: 1, kind: input, shape index: {}]   ;;  %s3672_s2 = inlined_call_operand.vmem [shape: f32[32,1], index: 2, kind: input, shape index: {}]   ;;  %s3673_s3 = inlined_call_operand.vmem [shape: f32[32,32], index: 3, kind: input, shape index: {}]   ;;  %s3674_s4 = inlined_call_operand.vmem [shape: f32[32,1], index: 4, kind: input, shape index: {}]   ;;  %s3675_s5 = inlined_call_operand.vmem [shape: f32[32,32], index: 5, kind: input, shape index: {}]   ;;  %s3676_s6 = inlined_call_operand.vmem [shape: f32[32,1], index: 6, kind: input, shape index: {}]   ;;  %s3677_s7 = inlined_call_operand.vmem [shape: f32[32,32], index: 7, kind: input, shape index: {}]   ;;  %s3678_s8 = inlined_call_operand.vmem [shape: f32[32,1], index: 8, kind: input, shape index: {}]   ;;  %s3679_s9 = inlined_call_operand.vmem [shape: f32[32,32], index: 9, kind: input, shape index: {}]   ;;  %s3680_s10 = inlined_call_operand.vmem [shape: f32[32,1], index: 10, kind: input, shape index: {}]   ;;  %s3681_s11 = inlined_call_operand.vmem [shape: f32[32,1], index: 11, kind: input, shape index: {}]   ;;  %s3682_s12 = inlined_call_operand.<no memory space> [shape: f32[1,1], index: 12, kind: input, shape index: {}]   ;;  %s3683_s13 = inlined_call_operand.hbm [shape: f32[8,1,128], index: 13, kind: output, shape index: {}]  }
   0x1   :  { %3684 = sst [smem:[#allocation7_spill]] %s3670_s0  ;;  %v18_v0 = vstv %s3682_s12 }
   0x2   :  { %19 = vst [vmem:[#allocation2] sm:$0x1] %v18_v0 }
   0x3   :  { %20 = vsyncpa [#allocation4], 0 }
   0x4   :  { %22 = vsyncpa [#allocation4 + $0x1], 0  ;;  %s3104_s27 = smov 0   ;;  %s3106_s28 = smov 0  }
   0x5   :  { %s3108_s29 = smov 0   ;;  %s3110_s30 = smov 0  }
   0x6 LB: > { %s3125_s12 = sadd.s32 4294967295, %s3025_s30   ;;  %s2323_s14 = sadd.s32 4294967294, %s3025_s30   ;;  %s3025_s30 = sphi %s3110_s30, %s3693_s30   ;;  %s3021_s29 = sphi %s3108_s29, %s3692_s29   ;;  %s3017_s28 = sphi %s3106_s28, %s3691_s28   ;;  %s3013_s27 = sphi %s3104_s27, %s3690_s27  }
   0x7   : > { %s3129_s15 = sadd.s32 1, %s3025_s30   ;;  %s313_s16 = sadd.s32 1, %s3021_s29 }
   0x8   : > { %s310_s17 = ssub.s32 %s3025_s30, %s3129_s15  ;;  %p323_p0 = scmp.ne.s32.totalorder %s3021_s29, %s3017_s28 }
   0x9   : > { %p311_p1 = scmp.eq.s32.totalorder %s310_s17, 0  ;;  %p324_p2 = scmp.eq.s32.totalorder %s3125_s12, 1 }
   0xa   : > { %p329_p3 = scmp.ne.s32.totalorder %s3017_s28, %s3013_s27  ;;  %p330_p4 = scmp.eq.s32.totalorder %s2323_s14, 1 }
   0xb   : > { %s3140_s18 = scalar_select %p311_p1, %s3021_s29, %s313_s16  }
   0xc   : > { %p3142_p5 = por %p324_p2, %p323_p0  ;;  %p3146_p6 = por %p330_p4, %p329_p3 }
   0xd   : > { %3685 = sst [smem:[#allocation6_spill]] %s3140_s18  ;;  %p2326_p7 = scmp.ge.s32.totalorder %s3025_s30, 1 }
   0xe   : > { %p392_p8 = scmp.lt.s32.totalorder %s3025_s30, 3 }
  0x10   : > { %p393_p9 = pnand %p2326_p7, %p392_p8 }
  0x11   : > { %s2328_s17 = sshll.u32 (!%p393_p9), %s3125_s12, 2  ;;  %s3688_s0 = sld [smem:[#allocation7_spill]] (!%p393_p9) }
  0x12   : > { %396 = sbr.rel (%p393_p9) target bundleno = 2443 (0x98b), region = 72  ;;  %p436_p10 = scmp.lt.s32.totalorder (!%p393_p9), %s2328_s17, 7 }
  0x13   : > { %s432_s18 = sand.u32 (!%p393_p9), 1, %s3017_s28   ;;  %s2408_s26 = sshll.u32 (!%p393_p9), %s3125_s12, 6 }
  0x14   : > { %s2327_s24 = sshll.u32 (!%p393_p9), %s432_s18, 2  ;;  %s3622_s21 = scalar_lea.hbm (!%p393_p9), %s3683_s13, %s2408_s26 }
  0x15   : > { %s3486_s25 = scalar_lea.vmem (!%p393_p9), [#allocation3], %s2327_s24  ;;  %s3630_s22 = scalar_lea.sflag (!%p393_p9), [#allocation4], %s432_s18 }
  0x16   : > { %s2264_s14 = sshll.u32 (!%p393_p9), %s3486_s25, 4  ;;  %s3028_s12 = smov (!%p393_p9), [#allocation3]   ;;  %s3624_s14 = int_to_ptr.vmem [resolvable:$true] %s2264_s14 }
  0x17   : > { %v448_v1 = vld [vmem:[%s3672_s2 + $0x18] sm:$0xff]  ;;  %v3027_v3 = vmov 0   ;;  %v443_v4 = vld [vmem:[%s3671_s1 + $0x10] sm:$0xff]  ;;  %v442_v5 = vld [vmem:[%s3671_s1 + $0x8] sm:$0xff]  ;;  %vm565_vm0 = vcmask 261120   ;;  %s3695_s17 = smov (!%p436_p10, %s2328_s17), 7 }
  0x18   : > { %v444_v2 = vld [vmem:[%s3671_s1 + $0x18] sm:$0xff]  ;;  %2804 = vset.pattern.permute.xlu1 %v3027_v3  ;;  %2803 = vset.pattern.permute.xlu0 %v3027_v3  ;;  %v447_v6 = vld [vmem:[%s3672_s2 + $0x10] sm:$0xff]  ;;  %v441_v7 = vld [vmem:[%s3671_s1] sm:$0xff]  ;;  %s438_s23 = scalar_lea.vmem %s3688_s0, %s3695_s17  ;;  %s2969_s24 = sshll.u32 %s3028_s12, 4  ;;  %s2970_s24 = int_to_ptr.vmem [resolvable:$false] %s2969_s24 }
  0x19   : > { %534 = vperm.xlu1 %2804, %v448_v1   ;;  %504 = vperm.xlu0 %2803, %v444_v2   ;;  %v446_v8 = vld [vmem:[%s3672_s2 + $0x8] sm:$0xff]  ;;  %v445_v9 = vld [vmem:[%s3672_s2] sm:$0xff]  ;;  %v456_v10 = vld [vmem:[%s3674_s4 + $0x18] sm:$0xff]  ;;  %s2971_s26 = scalar_lea.vmem %s2970_s24, 128  ;;  %p2972_p0 = scmp.lt.s32.totalorder %s3624_s14, %s2970_s24 }
  0x1a   : > { %v455_v11 = vld [vmem:[%s3674_s4 + $0x10] sm:$0xff]  ;;  %v454_v12 = vld [vmem:[%s3674_s4 + $0x8] sm:$0xff]  ;;  %v453_v13 = vld [vmem:[%s3674_s4] sm:$0xff] }
  0x1b   : > { %v464_v14 = vld [vmem:[%s3676_s6 + $0x18] sm:$0xff]  ;;  %v463_v15 = vld [vmem:[%s3676_s6 + $0x10] sm:$0xff]  ;;  %v462_v16 = vld [vmem:[%s3676_s6 + $0x8] sm:$0xff] }
  0x1c   : > { %v461_v17 = vld [vmem:[%s3676_s6] sm:$0xff]  ;;  %v472_v19 = vld [vmem:[%s3678_s8 + $0x18] sm:$0xff]  ;;  %v471_v20 = vld [vmem:[%s3678_s8 + $0x10] sm:$0xff] }
  0x1d   : > { %499 = vperm.xlu0 %2803, %v443_v4   ;;  %494 = vperm.xlu1 %2804, %v442_v5   ;;  %v3203_v18 = vld [vmem:[%s3673_s3] sm:$0xff]  ;;  %v470_v21 = vld [vmem:[%s3678_s8 + $0x8] sm:$0xff]  ;;  %v479_v25 = vld [vmem:[%s3680_s10 + $0x10] sm:$0xff] }
  0x1e   : > { %2545 = vmatprep.mubr.msk.f32.mxu0 %vm565_vm0, %v3203_v18  ;;  %v469_v22 = vld [vmem:[%s3678_s8] sm:$0xff]  ;;  %v478_v24 = vld [vmem:[%s3680_s10 + $0x8] sm:$0xff]  ;;  %v480_v26 = vld [vmem:[%s3680_s10 + $0x18] sm:$0xff] }
  0x1f   : > { %v477_v23 = vld [vmem:[%s3680_s10] sm:$0xff]  ;;  %v482_v28 = vld [vmem:[%s3681_s11 + $0x8] sm:$0xff]  ;;  %v483_v29 = vld [vmem:[%s3681_s11 + $0x10] sm:$0xff] }
  0x20   : > { %v481_v27 = vld [vmem:[%s3681_s11] sm:$0xff]  ;;  %v484_v30 = vld [vmem:[%s3681_s11 + $0x18] sm:$0xff] }
  0x21   : > { %529 = vperm.xlu0 %2803, %v447_v6   ;;  %489 = vperm.xlu1 %2804, %v441_v7   ;;  %v485_v31 = vld [vmem:[#allocation2] sm:$0x1]  ;;  %v2347_v33 = vld [vmem:[%s438_s23 + $0x1] ss:$0 sm:$0xff]  ;;  %v2366_v34 = vld [vmem:[%s438_s23 + $0x2] ss:$0 sm:$0xff] }
  0x22   : > { %v2329_v32 = vld [vmem:[%s438_s23] ss:$0 sm:$0xff]  ;;  %v2385_v35 = vld [vmem:[%s438_s23 + $0x3] ss:$0 sm:$0xff]  ;;  %s2965_s23 = scalar_lea.vmem %s3624_s14, 64 }
  0x23   : > { %p2966_p11 = scmp.ne.s32.totalorder %s3624_s14, %s2965_s23  ;;  %p2973_p1 = scmp.lt.s32.totalorder %s2971_s26, %s2965_s23 }
  0x25   : > { %524 = vperm.xlu0 %2803, %v446_v8   ;;  %519 = vperm.xlu1 %2804, %v445_v9   ;;  %p2967_p12 = pnand %p2966_p11, %p3142_p5  ;;  %p2974_p2 = por %p2973_p1, %p2972_p0 }
  0x27   : > { %p2968_p13 = pneg %p2967_p12 }
  0x29   : > { %562 = vperm.xlu0 %2803, %v456_v10   ;;  %557 = vperm.xlu1 %2804, %v455_v11   ;;  %p2975_p3 = pnand %p2974_p2, %p2968_p13 }
  0x2d   : > { %552 = vperm.xlu0 %2803, %v454_v12   ;;  %547 = vperm.xlu1 %2804, %v453_v13  }
  0x31   : > { %684 = vperm.xlu0 %2803, %v464_v14   ;;  %679 = vperm.xlu1 %2804, %v463_v15  }
  0x35   : > { %674 = vperm.xlu0 %2803, %v462_v16   ;;  %669 = vperm.xlu1 %2804, %v461_v17   ;;  %v3274_v16 = vld [vmem:[%s3673_s3 + $0x8] sm:$0xff]  ;;  %v3279_v17 = vld [vmem:[%s3673_s3 + $0x10] sm:$0xff] }
  0x39   : > { %805 = vperm.xlu0 %2803, %v472_v19   ;;  %800 = vperm.xlu1 %2804, %v471_v20   ;;  %v3288_v19 = vld [vmem:[%s3673_s3 + $0x18] sm:$0xff]  ;;  %v3295_v20 = vld [vmem:[%s3675_s5] sm:$0xff] }
  0x3a   : > { %2559 = vmatprep.mubr.msk.f32.mxu1 %vm565_vm0, %v3295_v20 }
  0x3d   : > { %795 = vperm.xlu0 %2803, %v470_v21   ;;  %790 = vperm.xlu1 %2804, %v469_v22  }
  0x41   : > { %911 = vperm.xlu0 %2803, %v477_v23   ;;  %916 = vperm.xlu1 %2804, %v478_v24  }
  0x45   : > { %921 = vperm.xlu0 %2803, %v479_v25   ;;  %926 = vperm.xlu1 %2804, %v480_v26  }
  0x49   : > { %1032 = vperm.xlu0 %2803, %v481_v27   ;;  %1037 = vperm.xlu1 %2804, %v482_v28  }
  0x4d   : > { %1042 = vperm.xlu0 %2803, %v483_v29   ;;  %1047 = vperm.xlu1 %2804, %v484_v30  }
  0x51   : > { %1065 = vperm.xlu0 %2803, %v485_v31  }
  0x94   : > { %v535_v36 = vpop.permute.xlu1 %534  ;;  %v505_v37 = vpop.permute.xlu0 %504 }
  0x95   : > { %v516_v38 = vmul.f32 %v2329_v32, %v505_v37  ;;  %v1085_v39 = vmul.f32 %v2347_v33, %v505_v37  ;;  %v1477_v40 = vmul.f32 %v2366_v34, %v505_v37  ;;  %v1869_v41 = vmul.f32 %v2385_v35, %v505_v37  ;;  %v3314_v37 = vld [vmem:[%s3675_s5 + $0x8] sm:$0xff] }
  0x97   : > { %v540_v42 = vadd.f32 %v535_v36, %v516_v38  ;;  %v3247_v43 = vadd.f32 %v1085_v39, %v535_v36  ;;  %v3249_v44 = vadd.f32 %v1477_v40, %v535_v36  ;;  %v3251_v45 = vadd.f32 %v1869_v41, %v535_v36  ;;  %v3319_v38 = vld [vmem:[%s3675_s5 + $0x10] sm:$0xff]  ;;  %v3328_v39 = vld [vmem:[%s3675_s5 + $0x18] sm:$0xff]  ;;  %v3335_v40 = vld [vmem:[%s3677_s7] sm:$0xff] }
  0x98   : > { %v500_v46 = vpop.permute.xlu0 %499  ;;  %v495_v47 = vpop.permute.xlu1 %494 }
  0x99   : > { %2805 = vtanh.f32 %v540_v42  ;;  %v1084_v48 = vmul.f32 %v2347_v33, %v500_v46  ;;  %v1476_v49 = vmul.f32 %v2366_v34, %v500_v46  ;;  %v1868_v50 = vmul.f32 %v2385_v35, %v500_v46 }
  0x9a   : > { %v1083_v51 = vmul.f32 %v2347_v33, %v495_v47  ;;  %v515_v52 = vmul.f32 %v2329_v32, %v500_v46  ;;  %v1475_v53 = vmul.f32 %v2366_v34, %v495_v47  ;;  %v1867_v54 = vmul.f32 %v2385_v35, %v495_v47 }
  0x9b   : > { %v514_v0 = vmul.f32 %v2329_v32, %v495_v47 }
  0x9c   : > { %v530_v55 = vpop.permute.xlu0 %529  ;;  %v490_v56 = vpop.permute.xlu1 %489 }
  0x9d   : > { %v539_v57 = vadd.f32 %v530_v55, %v515_v52  ;;  %v3253_v58 = vadd.f32 %v1084_v48, %v530_v55  ;;  %v3255_v59 = vadd.f32 %v1476_v49, %v530_v55  ;;  %v3257_v60 = vadd.f32 %v1868_v50, %v530_v55 }
  0x9e   : > { %v1082_v61 = vmul.f32 %v2347_v33, %v490_v56  ;;  %v1474_v62 = vmul.f32 %v2366_v34, %v490_v56  ;;  %v1866_v63 = vmul.f32 %v2385_v35, %v490_v56  ;;  %v513_v3 = vmul.f32 %v2329_v32, %v490_v56 }
  0x9f   : > { %2807 = vtanh.f32 %v539_v57 }
  0xa0   : > { %v525_v1 = vpop.permute.xlu0 %524  ;;  %v520_v2 = vpop.permute.xlu1 %519 }
  0xa1   : > { %v538_v4 = vadd.f32 %v525_v1, %v514_v0  ;;  %v3259_v5 = vadd.f32 %v1083_v51, %v525_v1  ;;  %v3261_v6 = vadd.f32 %v1475_v53, %v525_v1  ;;  %v3263_v7 = vadd.f32 %v1867_v54, %v525_v1  ;;  %v3372_v1 = vld [vmem:[%s3677_s7 + $0x18] sm:$0xff] }
  0xa2   : > { %v3265_v8 = vadd.f32 %v1082_v61, %v520_v2  ;;  %v537_v9 = vadd.f32 %v520_v2, %v513_v3  ;;  %v3267_v10 = vadd.f32 %v1474_v62, %v520_v2  ;;  %v3269_v11 = vadd.f32 %v1866_v63, %v520_v2 }
  0xa3   : > { %2809 = vtanh.f32 %v538_v4  ;;  %v3389_v4 = vld [vmem:[%s3679_s9] sm:$0xff] }
  0xa4   : > { %2811 = vtanh.f32 %v537_v9  ;;  %v3299_v21 = vpop.permute.xlu0 %562  ;;  %v3301_v23 = vpop.permute.xlu1 %557 }
  0xa6   : > { %v2806_v12 = vpop.eup %2805 }
  0xa7   : > { %2537 = vmatprep.subr.mxu0 %v2806_v12 }
  0xa8   : > { %2538 = vmatpush3.msra.mxu0 %v2806_v12  ;;  %v3304_v27 = vpop.permute.xlu0 %552  ;;  %v3308_v31 = vpop.permute.xlu1 %547 }
  0xac   : > { %v2808_v13 = vpop.eup %2807  ;;  %v3339_v41 = vpop.permute.xlu0 %684 }
  0xad   : > { %2539 = vmatprep.subr.mxu0 %v2808_v13  ;;  %v3341_v46 = vpop.permute.xlu1 %679 }
  0xae   : > { %2540 = vmatpush3.msra.mxu0 %v2808_v13 }
  0xb0   : > { %v2810_v14 = vpop.eup %2809  ;;  %v3344_v50 = vpop.permute.xlu0 %674 }
  0xb1   : > { %2541 = vmatprep.subr.mxu0 %v2810_v14  ;;  %v2812_v15 = vpop.eup %2811  ;;  %v3348_v54 = vpop.permute.xlu1 %669 }
  0xb2   : > { %2542 = vmatpush3.msra.mxu0 %v2810_v14 }
  0xb3   : > { %2543 = vmatprep.subr.mxu0 %v2812_v15 }
  0xb4   : > { %2544 = vmatpush3.msra.mxu0 %v2812_v15 }
  0xb5   : > { %2546 = vmatmul.mubr.msk.f32.vlgmr.msra.gmra.mxu0 %vm565_vm0, %v3274_v16  ;;  %v3395_v9 = vpop.permute.xlu1 %800 }
  0xb6   : > { %2548 = vmatprep.mubr.msk.f32.mxu0 %vm565_vm0, %v3279_v17 }
  0xb9   : > { %2549 = vmatmul.mubr.msk.f32.gmra.mxu0 %vm565_vm0, %v3288_v19 }
  0xba   : > { %2573 = vmatprep.mubr.msk.f32.mxu0 %vm565_vm0, %v3335_v40 }
 0x175   : > { %v2547_v22 = vpop.f32.mrf.mxu0 }
 0x176   : > { %v650_v29 = vadd.f32 %v2547_v22, %v3304_v27 }
 0x177   : > { %v644_v24 = vpop.f32.mrf.mxu0 }
 0x178   : > { %v645_v32 = vadd.f32 %v644_v24, %v3308_v31 }
 0x179   : > { %v2550_v25 = vpop.f32.mrf.mxu0 }
 0x17a   : > { %v660_v26 = vadd.f32 %v2550_v25, %v3299_v21 }
 0x17b   : > { %v654_v28 = vpop.f32.mrf.mxu0 }
 0x17c   : > { %2813 = vtanh.f32 %v660_v26  ;;  %v655_v30 = vadd.f32 %v654_v28, %v3301_v23  ;;  %v3402_v26 = vpop.permute.xlu1 %790 }
 0x17e   : > { %2815 = vtanh.f32 %v655_v30 }
 0x17f   : > { %2817 = vtanh.f32 %v650_v29 }
 0x180   : > { %2819 = vtanh.f32 %v645_v32 }
 0x189   : > { %v2814_v33 = vpop.eup %2813 }
 0x18a   : > { %2551 = vmatprep.subr.mxu1 %v2814_v33 }
 0x18b   : > { %v2816_v34 = vpop.eup %2815  ;;  %2552 = vmatpush3.msra.mxu1 %v2814_v33 }
 0x18c   : > { %2553 = vmatprep.subr.mxu1 %v2816_v34  ;;  %v2818_v35 = vpop.eup %2817 }
 0x18d   : > { %2554 = vmatpush3.msra.mxu1 %v2816_v34  ;;  %v2820_v36 = vpop.eup %2819 }
 0x18e   : > { %2555 = vmatprep.subr.mxu1 %v2818_v35 }
 0x18f   : > { %2556 = vmatpush3.msra.mxu1 %v2818_v35 }
 0x190   : > { %2557 = vmatprep.subr.mxu1 %v2820_v36 }
 0x191   : > { %2558 = vmatpush3.msra.mxu1 %v2820_v36 }
 0x192   : > { %2560 = vmatmul.mubr.msk.f32.vlgmr.msra.gmra.mxu1 %vm565_vm0, %v3314_v37 }
 0x193   : > { %2562 = vmatprep.mubr.msk.f32.mxu1 %vm565_vm0, %v3319_v38 }
 0x196   : > { %2563 = vmatmul.mubr.msk.f32.gmra.mxu1 %vm565_vm0, %v3328_v39 }
 0x197   : > { %2587 = vmatprep.mubr.msk.f32.mxu1 %vm565_vm0, %v3389_v4 }
 0x252   : > { %v2561_v42 = vpop.f32.mrf.mxu1 }
 0x253   : > { %v771_v52 = vadd.f32 %v2561_v42, %v3344_v50 }
 0x254   : > { %v765_v47 = vpop.f32.mrf.mxu1 }
 0x255   : > { %v766_v55 = vadd.f32 %v765_v47, %v3348_v54 }
 0x256   : > { %v2564_v48 = vpop.f32.mrf.mxu1 }
 0x257   : > { %v781_v49 = vadd.f32 %v2564_v48, %v3339_v41 }
 0x258   : > { %v775_v51 = vpop.f32.mrf.mxu1 }
 0x259   : > { %2821 = vtanh.f32 %v781_v49  ;;  %v776_v53 = vadd.f32 %v775_v51, %v3341_v46 }
 0x25b   : > { %2823 = vtanh.f32 %v776_v53  ;;  %v3417_v53 = vld [vmem:[%s3679_s9 + $0x10] sm:$0xff] }
 0x25c   : > { %2825 = vtanh.f32 %v771_v52  ;;  %v3412_v52 = vld [vmem:[%s3679_s9 + $0x8] sm:$0xff] }
 0x25d   : > { %2827 = vtanh.f32 %v766_v55 }
 0x25e   : > { %2829 = vtanh.f32 %v3247_v43  ;;  %v3358_v43 = vld [vmem:[%s3677_s7 + $0x8] sm:$0xff] }
 0x25f   : > { %2831 = vtanh.f32 %v3253_v58  ;;  %v3363_v58 = vld [vmem:[%s3677_s7 + $0x10] sm:$0xff] }
 0x260   : > { %2833 = vtanh.f32 %v3259_v5  ;;  %v3393_v5 = vpop.permute.xlu0 %805 }
 0x261   : > { %2835 = vtanh.f32 %v3265_v8 }
 0x264   : > { %v3398_v15 = vpop.permute.xlu0 %795 }
 0x266   : > { %v2822_v56 = vpop.eup %2821 }
 0x267   : > { %2565 = vmatprep.subr.mxu0 %v2822_v56 }
 0x268   : > { %v2824_v57 = vpop.eup %2823  ;;  %2566 = vmatpush3.msra.mxu0 %v2822_v56 }
 0x269   : > { %2567 = vmatprep.subr.mxu0 %v2824_v57  ;;  %v2826_v61 = vpop.eup %2825 }
 0x26a   : > { %2568 = vmatpush3.msra.mxu0 %v2824_v57  ;;  %v2828_v62 = vpop.eup %2827  ;;  %v3426_v57 = vld [vmem:[%s3679_s9 + $0x18] sm:$0xff] }
 0x26b   : > { %2569 = vmatprep.subr.mxu0 %v2826_v61  ;;  %v2830_v63 = vpop.eup %2829 }
 0x26c   : > { %2570 = vmatpush3.msra.mxu0 %v2826_v61  ;;  %v2832_v0 = vpop.eup %2831 }
 0x26d   : > { %2571 = vmatprep.subr.mxu0 %v2828_v62  ;;  %v2834_v2 = vpop.eup %2833 }
 0x26e   : > { %2572 = vmatpush3.msra.mxu0 %v2828_v62  ;;  %v2836_v3 = vpop.eup %2835 }
 0x26f   : > { %2574 = vmatmul.mubr.msk.f32.vlgmr.msra.gmra.mxu0 %vm565_vm0, %v3358_v43  ;;  %2593 = vmatprep.subr.mxu0 %v2830_v63 }
 0x270   : > { %2594 = vmatpush3.msra.mxu0 %v2830_v63  ;;  %2576 = vmatprep.mubr.msk.f32.mxu0 %vm565_vm0, %v3363_v58  ;;  %v3440_v63 = vpop.permute.xlu1 %916 }
 0x271   : > { %2595 = vmatprep.subr.mxu0 %v2832_v0 }
 0x272   : > { %2596 = vmatpush3.msra.mxu0 %v2832_v0  ;;  %v3442_v0 = vpop.permute.xlu0 %911 }
 0x273   : > { %2577 = vmatmul.mubr.msk.f32.gmra.mxu0 %vm565_vm0, %v3372_v1  ;;  %2597 = vmatprep.subr.mxu0 %v2834_v2 }
 0x274   : > { %2598 = vmatpush3.msra.mxu0 %v2834_v2  ;;  %2601 = vmatprep.mubr.msk.f32.mxu0 %vm565_vm0, %v3203_v18 }
 0x275   : > { %2599 = vmatprep.subr.mxu0 %v2836_v3 }
 0x276   : > { %2600 = vmatpush3.msra.mxu0 %v2836_v3 }
 0x277   : > { %2602 = vmatmul.mubr.msk.f32.vlgmr.msra.gmra.mxu0 %vm565_vm0, %v3274_v16 }
 0x278   : > { %2604 = vmatprep.mubr.msk.f32.mxu0 %vm565_vm0, %v3279_v17 }
 0x27b   : > { %2605 = vmatmul.mubr.msk.f32.gmra.mxu0 %vm565_vm0, %v3288_v19 }
 0x27c   : > { %2629 = vmatprep.mubr.msk.f32.mxu0 %vm565_vm0, %v3335_v40 }
 0x32f   : > { %v2575_v8 = vpop.f32.mrf.mxu0 }
 0x330   : > { %v892_v24 = vadd.f32 %v2575_v8, %v3398_v15 }
 0x331   : > { %v886_v12 = vpop.f32.mrf.mxu0 }
 0x332   : > { %v887_v29 = vadd.f32 %v886_v12, %v3402_v26 }
 0x333   : > { %v2578_v13 = vpop.f32.mrf.mxu0 }
 0x334   : > { %v902_v14 = vadd.f32 %v2578_v13, %v3393_v5  ;;  %v3446_v13 = vpop.permute.xlu1 %926 }
 0x335   : > { %v896_v22 = vpop.f32.mrf.mxu0 }
 0x336   : > { %2837 = vtanh.f32 %v902_v14  ;;  %v897_v25 = vadd.f32 %v896_v22, %v3395_v9 }
 0x337   : > { %v2603_v28 = vpop.f32.mrf.mxu0 }
 0x338   : > { %2839 = vtanh.f32 %v897_v25  ;;  %v1166_v35 = vadd.f32 %v2603_v28, %v3304_v27 }
 0x339   : > { %v1160_v30 = vpop.f32.mrf.mxu0  ;;  %2841 = vtanh.f32 %v892_v24  ;;  %v3449_v24 = vpop.permute.xlu0 %921 }
 0x33a   : > { %2843 = vtanh.f32 %v887_v29  ;;  %v1161_v42 = vadd.f32 %v1160_v30, %v3308_v31 }
 0x33b   : > { %v2606_v32 = vpop.f32.mrf.mxu0 }
 0x33c   : > { %v1176_v33 = vadd.f32 %v2606_v32, %v3299_v21 }
 0x33d   : > { %v1170_v34 = vpop.f32.mrf.mxu0 }
 0x33e   : > { %2845 = vtanh.f32 %v1176_v33  ;;  %v1171_v36 = vadd.f32 %v1170_v34, %v3301_v23 }
 0x340   : > { %2847 = vtanh.f32 %v1171_v36 }
 0x341   : > { %2849 = vtanh.f32 %v1166_v35 }
 0x342   : > { %2851 = vtanh.f32 %v1161_v42  ;;  %v3455_v42 = vpop.permute.xlu0 %1032 }
 0x343   : > { %v2838_v47 = vpop.eup %2837 }
 0x344   : > { %2579 = vmatprep.subr.mxu1 %v2838_v47 }
 0x345   : > { %v2840_v48 = vpop.eup %2839  ;;  %2580 = vmatpush3.msra.mxu1 %v2838_v47 }
 0x346   : > { %2581 = vmatprep.subr.mxu1 %v2840_v48  ;;  %v2842_v49 = vpop.eup %2841 }
 0x347   : > { %2582 = vmatpush3.msra.mxu1 %v2840_v48  ;;  %v2844_v51 = vpop.eup %2843 }
 0x348   : > { %2583 = vmatprep.subr.mxu1 %v2842_v49 }
 0x349   : > { %2584 = vmatpush3.msra.mxu1 %v2842_v49 }
 0x34a   : > { %2585 = vmatprep.subr.mxu1 %v2844_v51 }
 0x34b   : > { %v2846_v55 = vpop.eup %2845  ;;  %2586 = vmatpush3.msra.mxu1 %v2844_v51  ;;  %v3458_v51 = vpop.permute.xlu1 %1037 }
 0x34c   : > { %2588 = vmatmul.mubr.msk.f32.vlgmr.msra.gmra.mxu1 %vm565_vm0, %v3412_v52  ;;  %2607 = vmatprep.subr.mxu1 %v2846_v55 }
 0x34d   : > { %v2848_v56 = vpop.eup %2847  ;;  %2608 = vmatpush3.msra.mxu1 %v2846_v55  ;;  %2590 = vmatprep.mubr.msk.f32.mxu1 %vm565_vm0, %v3417_v53 }
 0x34e   : > { %2609 = vmatprep.subr.mxu1 %v2848_v56  ;;  %v2850_v61 = vpop.eup %2849 }
 0x34f   : > { %2610 = vmatpush3.msra.mxu1 %v2848_v56  ;;  %v2852_v62 = vpop.eup %2851 }
 0x350   : > { %2591 = vmatmul.mubr.msk.f32.gmra.mxu1 %vm565_vm0, %v3426_v57  ;;  %2611 = vmatprep.subr.mxu1 %v2850_v61 }
 0x351   : > { %2612 = vmatpush3.msra.mxu1 %v2850_v61  ;;  %2615 = vmatprep.mubr.msk.f32.mxu1 %vm565_vm0, %v3295_v20 }
 0x352   : > { %2613 = vmatprep.subr.mxu1 %v2852_v62 }
 0x353   : > { %2614 = vmatpush3.msra.mxu1 %v2852_v62 }
 0x354   : > { %2616 = vmatmul.mubr.msk.f32.vlgmr.msra.gmra.mxu1 %vm565_vm0, %v3314_v37 }
 0x355   : > { %2618 = vmatprep.mubr.msk.f32.mxu1 %vm565_vm0, %v3319_v38 }
 0x358   : > { %2619 = vmatmul.mubr.msk.f32.gmra.mxu1 %vm565_vm0, %v3328_v39 }
 0x359   : > { %2643 = vmatprep.mubr.msk.f32.mxu1 %vm565_vm0, %v3389_v4 }
 0x40c   : > { %v2589_v2 = vpop.f32.mrf.mxu1 }
 0x40d   : > { %v1013_v3 = vadd.f32 %v2589_v2, %v3440_v63  ;;  %v3462_v2 = vpop.permute.xlu0 %1042 }
 0x40e   : > { %v1007_v8 = vpop.f32.mrf.mxu1 }
 0x40f   : > { %v1008_v12 = vadd.f32 %v1007_v8, %v3442_v0  ;;  %2853 = vtanh.f32 %v1013_v3 }
 0x410   : > { %v2592_v14 = vpop.f32.mrf.mxu1 }
 0x411   : > { %2855 = vtanh.f32 %v1008_v12  ;;  %v1023_v22 = vadd.f32 %v2592_v14, %v3446_v13  ;;  %v3466_v12 = vpop.permute.xlu1 %1047 }
 0x412   : > { %v1017_v25 = vpop.f32.mrf.mxu1 }
 0x413   : > { %v1018_v28 = vadd.f32 %v1017_v25, %v3449_v24  ;;  %2857 = vtanh.f32 %v1023_v22  ;;  %v1068_v25 = vlaneseq }
 0x414   : > { %v2617_v29 = vpop.f32.mrf.mxu1 }
 0x415   : > { %2859 = vtanh.f32 %v1018_v28  ;;  %v1255_v35 = vadd.f32 %v2617_v29, %v3344_v50 }
 0x416   : > { %v1249_v30 = vpop.f32.mrf.mxu1 }
 0x417   : > { %v1250_v48 = vadd.f32 %v1249_v30, %v3348_v54 }
 0x418   : > { %v2620_v32 = vpop.f32.mrf.mxu1 }
 0x419   : > { %v1265_v33 = vadd.f32 %v2620_v32, %v3339_v41  ;;  %v1069_v32 = vshrl.u32 %v1068_v25, 7 }
 0x41a   : > { %v1259_v34 = vpop.f32.mrf.mxu1 }
 0x41b   : > { %2861 = vtanh.f32 %v1265_v33  ;;  %v1260_v36 = vadd.f32 %v1259_v34, %v3341_v46 }
 0x41c   : > { %v2854_v47 = vpop.eup %2853 }
 0x41d   : > { %2863 = vtanh.f32 %v1260_v36  ;;  %v1051_v61 = vmul.f32 %v2854_v47, %v3458_v51 }
 0x41e   : > { %v2856_v49 = vpop.eup %2855  ;;  %2865 = vtanh.f32 %v1255_v35 }
 0x41f   : > { %v1050_v55 = vmul.f32 %v2856_v49, %v3455_v42  ;;  %2867 = vtanh.f32 %v1250_v48 }
 0x420   : > { %v2858_v56 = vpop.eup %2857  ;;  %2869 = vtanh.f32 %v3249_v44 }
 0x421   : > { %v1054_v3 = vadd.f32 %v1051_v61, %v1050_v55  ;;  %2871 = vtanh.f32 %v3255_v59  ;;  %v1053_v14 = vmul.f32 %v2858_v56, %v3466_v12 }
 0x422   : > { %v2860_v62 = vpop.eup %2859  ;;  %2873 = vtanh.f32 %v3261_v6  ;;  %v1070_v6 = vsub.s32 0, %v1069_v32 }
 0x423   : > { %v1052_v8 = vmul.f32 %v2860_v62, %v3462_v2  ;;  %2875 = vtanh.f32 %v3267_v10  ;;  %v1066_v10 = vpop.permute.xlu0 %1065 }
 0x424   : > { %v3479_v55 = vrot.slane %v1066_v10, %v1070_v6 }
 0x425   : > { %v1055_v22 = vadd.f32 %v1054_v3, %v1052_v8 }
 0x427   : > { %v1056_v28 = vadd.f32 %v1055_v22, %v1053_v14 }
 0x428   : > { %v2862_v29 = vpop.eup %2861 }
 0x429   : > { %v1057_v30 = vrot.slane %v1056_v28, 4  ;;  %2621 = vmatprep.subr.mxu0 %v2862_v29 }
 0x42a   : > { %v2864_v44 = vpop.eup %2863  ;;  %2622 = vmatpush3.msra.mxu0 %v2862_v29 }
 0x42b   : > { %v1058_v33 = vadd.f32 %v1057_v30, %v1056_v28  ;;  %2623 = vmatprep.subr.mxu0 %v2864_v44  ;;  %v2866_v34 = vpop.eup %2865 }
 0x42c   : > { %2624 = vmatpush3.msra.mxu0 %v2864_v44  ;;  %v2868_v35 = vpop.eup %2867 }
 0x42d   : > { %v1059_v59 = vrot.slane %v1058_v33, 2  ;;  %2625 = vmatprep.subr.mxu0 %v2866_v34  ;;  %v2870_v47 = vpop.eup %2869 }
 0x42e   : > { %2626 = vmatpush3.msra.mxu0 %v2866_v34  ;;  %v2872_v49 = vpop.eup %2871 }
 0x42f   : > { %v1060_v36 = vadd.f32 %v1059_v59, %v1058_v33  ;;  %2627 = vmatprep.subr.mxu0 %v2868_v35  ;;  %v2874_v61 = vpop.eup %2873 }
 0x430   : > { %2628 = vmatpush3.msra.mxu0 %v2868_v35  ;;  %v2876_v3 = vpop.eup %2875 }
 0x431   : > { %v1061_v48 = vrot.slane %v1060_v36, 1  ;;  %2630 = vmatmul.mubr.msk.f32.vlgmr.msra.gmra.mxu0 %vm565_vm0, %v3358_v43  ;;  %2649 = vmatprep.subr.mxu0 %v2870_v47 }
 0x432   : > { %2650 = vmatpush3.msra.mxu0 %v2870_v47  ;;  %2632 = vmatprep.mubr.msk.f32.mxu0 %vm565_vm0, %v3363_v58 }
 0x433   : > { %2651 = vmatprep.subr.mxu0 %v2872_v49  ;;  %v1062_v56 = vadd.f32 %v1061_v48, %v1060_v36 }
 0x434   : > { %2652 = vmatpush3.msra.mxu0 %v2872_v49 }
 0x435   : > { %2633 = vmatmul.mubr.msk.f32.gmra.mxu0 %vm565_vm0, %v3372_v1  ;;  %2653 = vmatprep.subr.mxu0 %v2874_v61  ;;  %v1072_v62 = vadd.f32 %v3479_v55, %v1062_v56 }
 0x436   : > { %2654 = vmatpush3.msra.mxu0 %v2874_v61  ;;  %2657 = vmatprep.mubr.msk.f32.mxu0 %vm565_vm0, %v3203_v18 }
 0x437   : > { %2655 = vmatprep.subr.mxu0 %v2876_v3  ;;  %1073 = vst [vmem:[%s3486_s25] sm:$0x1] %v1072_v62 }
 0x438   : > { %2656 = vmatpush3.msra.mxu0 %v2876_v3 }
 0x439   : > { %2658 = vmatmul.mubr.msk.f32.vlgmr.msra.gmra.mxu0 %vm565_vm0, %v3274_v16 }
 0x43a   : > { %2660 = vmatprep.mubr.msk.f32.mxu0 %vm565_vm0, %v3279_v17 }
 0x43d   : > { %2661 = vmatmul.mubr.msk.f32.gmra.mxu0 %vm565_vm0, %v3288_v19 }
 0x43e   : > { %2685 = vmatprep.mubr.msk.f32.mxu0 %vm565_vm0, %v3335_v40 }
 0x4f1   : > { %v2631_v8 = vpop.f32.mrf.mxu0 }
 0x4f2   : > { %v1344_v29 = vadd.f32 %v2631_v8, %v3398_v15 }
 0x4f3   : > { %v1338_v14 = vpop.f32.mrf.mxu0 }
 0x4f4   : > { %v1339_v32 = vadd.f32 %v1338_v14, %v3402_v26 }
 0x4f5   : > { %v2634_v22 = vpop.f32.mrf.mxu0 }
 0x4f6   : > { %v1354_v25 = vadd.f32 %v2634_v22, %v3393_v5 }
 0x4f7   : > { %v1348_v28 = vpop.f32.mrf.mxu0 }
 0x4f8   : > { %2877 = vtanh.f32 %v1354_v25  ;;  %v1349_v30 = vadd.f32 %v1348_v28, %v3395_v9 }
 0x4f9   : > { %v2659_v44 = vpop.f32.mrf.mxu0 }
 0x4fa   : > { %2879 = vtanh.f32 %v1349_v30  ;;  %v1558_v6 = vadd.f32 %v2659_v44, %v3304_v27 }
 0x4fb   : > { %v1552_v33 = vpop.f32.mrf.mxu0  ;;  %2881 = vtanh.f32 %v1344_v29 }
 0x4fc   : > { %2883 = vtanh.f32 %v1339_v32  ;;  %v1553_v47 = vadd.f32 %v1552_v33, %v3308_v31 }
 0x4fd   : > { %v2662_v34 = vpop.f32.mrf.mxu0 }
 0x4fe   : > { %v1568_v59 = vadd.f32 %v2662_v34, %v3299_v21 }
 0x4ff   : > { %v1562_v35 = vpop.f32.mrf.mxu0 }
 0x500   : > { %2885 = vtanh.f32 %v1568_v59  ;;  %v1563_v36 = vadd.f32 %v1562_v35, %v3301_v23 }
 0x502   : > { %2887 = vtanh.f32 %v1563_v36 }
 0x503   : > { %2889 = vtanh.f32 %v1558_v6 }
 0x504   : > { %2891 = vtanh.f32 %v1553_v47 }
 0x505   : > { %v2878_v10 = vpop.eup %2877 }
 0x506   : > { %2635 = vmatprep.subr.mxu1 %v2878_v10 }
 0x507   : > { %v2880_v48 = vpop.eup %2879  ;;  %2636 = vmatpush3.msra.mxu1 %v2878_v10 }
 0x508   : > { %2637 = vmatprep.subr.mxu1 %v2880_v48  ;;  %v2882_v49 = vpop.eup %2881 }
 0x509   : > { %2638 = vmatpush3.msra.mxu1 %v2880_v48  ;;  %v2884_v56 = vpop.eup %2883 }
 0x50a   : > { %2639 = vmatprep.subr.mxu1 %v2882_v49 }
 0x50b   : > { %2640 = vmatpush3.msra.mxu1 %v2882_v49 }
 0x50c   : > { %2641 = vmatprep.subr.mxu1 %v2884_v56 }
 0x50d   : > { %v2886_v61 = vpop.eup %2885  ;;  %2642 = vmatpush3.msra.mxu1 %v2884_v56 }
 0x50e   : > { %2644 = vmatmul.mubr.msk.f32.vlgmr.msra.gmra.mxu1 %vm565_vm0, %v3412_v52  ;;  %2663 = vmatprep.subr.mxu1 %v2886_v61 }
 0x50f   : > { %v2888_v62 = vpop.eup %2887  ;;  %2664 = vmatpush3.msra.mxu1 %v2886_v61  ;;  %2646 = vmatprep.mubr.msk.f32.mxu1 %vm565_vm0, %v3417_v53 }
 0x510   : > { %2665 = vmatprep.subr.mxu1 %v2888_v62  ;;  %v2890_v3 = vpop.eup %2889 }
 0x511   : > { %2666 = vmatpush3.msra.mxu1 %v2888_v62  ;;  %v2892_v8 = vpop.eup %2891 }
 0x512   : > { %2647 = vmatmul.mubr.msk.f32.gmra.mxu1 %vm565_vm0, %v3426_v57  ;;  %2667 = vmatprep.subr.mxu1 %v2890_v3 }
 0x513   : > { %2668 = vmatpush3.msra.mxu1 %v2890_v3  ;;  %2671 = vmatprep.mubr.msk.f32.mxu1 %vm565_vm0, %v3295_v20 }
 0x514   : > { %2669 = vmatprep.subr.mxu1 %v2892_v8 }
 0x515   : > { %2670 = vmatpush3.msra.mxu1 %v2892_v8 }
 0x516   : > { %2672 = vmatmul.mubr.msk.f32.vlgmr.msra.gmra.mxu1 %vm565_vm0, %v3314_v37 }
 0x517   : > { %2674 = vmatprep.mubr.msk.f32.mxu1 %vm565_vm0, %v3319_v38 }
 0x51a   : > { %2675 = vmatmul.mubr.msk.f32.gmra.mxu1 %vm565_vm0, %v3328_v39 }
 0x51b   : > { %2699 = vmatprep.mubr.msk.f32.mxu1 %vm565_vm0, %v3389_v4 }
 0x5ce   : > { %v2645_v14 = vpop.f32.mrf.mxu1 }
 0x5cf   : > { %v1433_v22 = vadd.f32 %v2645_v14, %v3440_v63 }
 0x5d0   : > { %v1427_v25 = vpop.f32.mrf.mxu1 }
 0x5d1   : > { %v1428_v28 = vadd.f32 %v1427_v25, %v3442_v0  ;;  %2893 = vtanh.f32 %v1433_v22 }
 0x5d2   : > { %v2648_v29 = vpop.f32.mrf.mxu1 }
 0x5d3   : > { %2895 = vtanh.f32 %v1428_v28  ;;  %v1443_v30 = vadd.f32 %v2648_v29, %v3446_v13 }
 0x5d4   : > { %v1437_v44 = vpop.f32.mrf.mxu1 }
 0x5d5   : > { %v1438_v32 = vadd.f32 %v1437_v44, %v3449_v24  ;;  %2897 = vtanh.f32 %v1443_v30 }
 0x5d6   : > { %v2673_v33 = vpop.f32.mrf.mxu1 }
 0x5d7   : > { %2899 = vtanh.f32 %v1438_v32  ;;  %v1647_v36 = vadd.f32 %v2673_v33, %v3344_v50 }
 0x5d8   : > { %v1641_v34 = vpop.f32.mrf.mxu1 }
 0x5d9   : > { %v1642_v48 = vadd.f32 %v1641_v34, %v3348_v54 }
 0x5da   : > { %v2676_v59 = vpop.f32.mrf.mxu1 }
 0x5db   : > { %v1657_v35 = vadd.f32 %v2676_v59, %v3339_v41 }
 0x5dc   : > { %v1651_v6 = vpop.f32.mrf.mxu1 }
 0x5dd   : > { %2901 = vtanh.f32 %v1657_v35  ;;  %v1652_v47 = vadd.f32 %v1651_v6, %v3341_v46 }
 0x5de   : > { %v2894_v10 = vpop.eup %2893 }
 0x5df   : > { %2903 = vtanh.f32 %v1652_v47  ;;  %v1451_v62 = vmul.f32 %v2894_v10, %v3458_v51 }
 0x5e0   : > { %v2896_v49 = vpop.eup %2895  ;;  %2905 = vtanh.f32 %v1647_v36 }
 0x5e1   : > { %v1450_v56 = vmul.f32 %v2896_v49, %v3455_v42  ;;  %2907 = vtanh.f32 %v1642_v48 }
 0x5e2   : > { %v2898_v61 = vpop.eup %2897  ;;  %2909 = vtanh.f32 %v3251_v45 }
 0x5e3   : > { %v1454_v8 = vadd.f32 %v1451_v62, %v1450_v56  ;;  %2911 = vtanh.f32 %v3257_v60  ;;  %v1453_v22 = vmul.f32 %v2898_v61, %v3466_v12 }
 0x5e4   : > { %v2900_v3 = vpop.eup %2899  ;;  %2913 = vtanh.f32 %v3263_v7 }
 0x5e5   : > { %v1452_v14 = vmul.f32 %v2900_v3, %v3462_v2  ;;  %2915 = vtanh.f32 %v3269_v11 }
 0x5e7   : > { %v1455_v25 = vadd.f32 %v1454_v8, %v1452_v14 }
 0x5e9   : > { %v1456_v28 = vadd.f32 %v1455_v25, %v1453_v22 }
 0x5ea   : > { %v2902_v29 = vpop.eup %2901 }
 0x5eb   : > { %v1457_v30 = vrot.slane %v1456_v28, 4  ;;  %2677 = vmatprep.subr.mxu0 %v2902_v29 }
 0x5ec   : > { %v2904_v44 = vpop.eup %2903  ;;  %2678 = vmatpush3.msra.mxu0 %v2902_v29 }
 0x5ed   : > { %v1458_v32 = vadd.f32 %v1457_v30, %v1456_v28  ;;  %2679 = vmatprep.subr.mxu0 %v2904_v44  ;;  %v2906_v45 = vpop.eup %2905 }
 0x5ee   : > { %2680 = vmatpush3.msra.mxu0 %v2904_v44  ;;  %v2908_v60 = vpop.eup %2907 }
 0x5ef   : > { %v1459_v33 = vrot.slane %v1458_v32, 2  ;;  %2681 = vmatprep.subr.mxu0 %v2906_v45  ;;  %v2910_v59 = vpop.eup %2909 }
 0x5f0   : > { %2682 = vmatpush3.msra.mxu0 %v2906_v45  ;;  %v2912_v11 = vpop.eup %2911 }
 0x5f1   : > { %v1460_v34 = vadd.f32 %v1459_v33, %v1458_v32  ;;  %2683 = vmatprep.subr.mxu0 %v2908_v60  ;;  %v2914_v6 = vpop.eup %2913 }
 0x5f2   : > { %2684 = vmatpush3.msra.mxu0 %v2908_v60  ;;  %v2916_v47 = vpop.eup %2915 }
 0x5f3   : > { %v1461_v7 = vrot.slane %v1460_v34, 1  ;;  %2686 = vmatmul.mubr.msk.f32.vlgmr.msra.gmra.mxu0 %vm565_vm0, %v3358_v43  ;;  %2705 = vmatprep.subr.mxu0 %v2910_v59 }
 0x5f4   : > { %2706 = vmatpush3.msra.mxu0 %v2910_v59  ;;  %2688 = vmatprep.mubr.msk.f32.mxu0 %vm565_vm0, %v3363_v58 }
 0x5f5   : > { %2707 = vmatprep.subr.mxu0 %v2912_v11  ;;  %v1462_v35 = vadd.f32 %v1461_v7, %v1460_v34 }
 0x5f6   : > { %2708 = vmatpush3.msra.mxu0 %v2912_v11 }
 0x5f7   : > { %2689 = vmatmul.mubr.msk.f32.gmra.mxu0 %vm565_vm0, %v3372_v1  ;;  %2709 = vmatprep.subr.mxu0 %v2914_v6  ;;  %v1463_v36 = vadd.f32 %v1462_v35, %v3479_v55 }
 0x5f8   : > { %2710 = vmatpush3.msra.mxu0 %v2914_v6  ;;  %2713 = vmatprep.mubr.msk.f32.mxu0 %vm565_vm0, %v3203_v18 }
 0x5f9   : > { %2711 = vmatprep.subr.mxu0 %v2916_v47  ;;  %2364 = vst [vmem:[%s3486_s25 + $0x1] sm:$0x1] %v1463_v36 }
 0x5fa   : > { %2712 = vmatpush3.msra.mxu0 %v2916_v47 }
 0x5fb   : > { %2714 = vmatmul.mubr.msk.f32.vlgmr.msra.gmra.mxu0 %vm565_vm0, %v3274_v16 }
 0x5fc   : > { %2716 = vmatprep.mubr.msk.f32.mxu0 %vm565_vm0, %v3279_v17 }
 0x5ff   : > { %2717 = vmatmul.mubr.msk.f32.gmra.mxu0 %vm565_vm0, %v3288_v19 }
 0x600   : > { %2741 = vmatprep.mubr.msk.f32.mxu0 %vm565_vm0, %v3335_v40 }
 0x6b3   : > { %v2687_v10 = vpop.f32.mrf.mxu0 }
 0x6b4   : > { %v1736_v61 = vadd.f32 %v2687_v10, %v3398_v15 }
 0x6b5   : > { %v1730_v48 = vpop.f32.mrf.mxu0 }
 0x6b6   : > { %v1731_v17 = vadd.f32 %v1730_v48, %v3402_v26 }
 0x6b7   : > { %v2690_v49 = vpop.f32.mrf.mxu0 }
 0x6b8   : > { %v1746_v18 = vadd.f32 %v2690_v49, %v3393_v5 }
 0x6b9   : > { %v1740_v56 = vpop.f32.mrf.mxu0 }
 0x6ba   : > { %2917 = vtanh.f32 %v1746_v18  ;;  %v1741_v16 = vadd.f32 %v1740_v56, %v3395_v9 }
 0x6bb   : > { %v2715_v62 = vpop.f32.mrf.mxu0 }
 0x6bc   : > { %2919 = vtanh.f32 %v1741_v16  ;;  %v1950_v14 = vadd.f32 %v2715_v62, %v3304_v27 }
 0x6bd   : > { %v1944_v3 = vpop.f32.mrf.mxu0  ;;  %2921 = vtanh.f32 %v1736_v61 }
 0x6be   : > { %2923 = vtanh.f32 %v1731_v17  ;;  %v1945_v25 = vadd.f32 %v1944_v3, %v3308_v31 }
 0x6bf   : > { %v2718_v19 = vpop.f32.mrf.mxu0 }
 0x6c0   : > { %v1960_v40 = vadd.f32 %v2718_v19, %v3299_v21 }
 0x6c1   : > { %v1954_v8 = vpop.f32.mrf.mxu0 }
 0x6c2   : > { %2925 = vtanh.f32 %v1960_v40  ;;  %v1955_v22 = vadd.f32 %v1954_v8, %v3301_v23 }
 0x6c4   : > { %2927 = vtanh.f32 %v1955_v22 }
 0x6c5   : > { %2929 = vtanh.f32 %v1950_v14 }
 0x6c6   : > { %2931 = vtanh.f32 %v1945_v25 }
 0x6c7   : > { %v2918_v28 = vpop.eup %2917 }
 0x6c8   : > { %2691 = vmatprep.subr.mxu1 %v2918_v28 }
 0x6c9   : > { %v2920_v29 = vpop.eup %2919  ;;  %2692 = vmatpush3.msra.mxu1 %v2918_v28 }
 0x6ca   : > { %2693 = vmatprep.subr.mxu1 %v2920_v29  ;;  %v2922_v30 = vpop.eup %2921 }
 0x6cb   : > { %2694 = vmatpush3.msra.mxu1 %v2920_v29  ;;  %v2924_v21 = vpop.eup %2923 }
 0x6cc   : > { %2695 = vmatprep.subr.mxu1 %v2922_v30 }
 0x6cd   : > { %2696 = vmatpush3.msra.mxu1 %v2922_v30 }
 0x6ce   : > { %2697 = vmatprep.subr.mxu1 %v2924_v21 }
 0x6cf   : > { %v2926_v27 = vpop.eup %2925  ;;  %2698 = vmatpush3.msra.mxu1 %v2924_v21 }
 0x6d0   : > { %2700 = vmatmul.mubr.msk.f32.vlgmr.msra.gmra.mxu1 %vm565_vm0, %v3412_v52  ;;  %2719 = vmatprep.subr.mxu1 %v2926_v27 }
 0x6d1   : > { %v2928_v23 = vpop.eup %2927  ;;  %2720 = vmatpush3.msra.mxu1 %v2926_v27  ;;  %2702 = vmatprep.mubr.msk.f32.mxu1 %vm565_vm0, %v3417_v53 }
 0x6d2   : > { %2721 = vmatprep.subr.mxu1 %v2928_v23  ;;  %v2930_v31 = vpop.eup %2929 }
 0x6d3   : > { %2722 = vmatpush3.msra.mxu1 %v2928_v23  ;;  %v2932_v44 = vpop.eup %2931 }
 0x6d4   : > { %2703 = vmatmul.mubr.msk.f32.gmra.mxu1 %vm565_vm0, %v3426_v57  ;;  %2723 = vmatprep.subr.mxu1 %v2930_v31 }
 0x6d5   : > { %2724 = vmatpush3.msra.mxu1 %v2930_v31  ;;  %2727 = vmatprep.mubr.msk.f32.mxu1 %vm565_vm0, %v3295_v20 }
 0x6d6   : > { %2725 = vmatprep.subr.mxu1 %v2932_v44 }
 0x6d7   : > { %2726 = vmatpush3.msra.mxu1 %v2932_v44 }
 0x6d8   : > { %2728 = vmatmul.mubr.msk.f32.vlgmr.msra.gmra.mxu1 %vm565_vm0, %v3314_v37 }
 0x6d9   : > { %2730 = vmatprep.mubr.msk.f32.mxu1 %vm565_vm0, %v3319_v38 }
 0x6dc   : > { %2731 = vmatmul.mubr.msk.f32.gmra.mxu1 %vm565_vm0, %v3328_v39 }
 0x6dd   : > { %2755 = vmatprep.mubr.msk.f32.mxu1 %vm565_vm0, %v3389_v4 }
 0x790   : > { %v2701_v32 = vpop.f32.mrf.mxu1 }
 0x791   : > { %v1825_v45 = vadd.f32 %v2701_v32, %v3440_v63 }
 0x792   : > { %v1819_v33 = vpop.f32.mrf.mxu1 }
 0x793   : > { %v1820_v20 = vadd.f32 %v1819_v33, %v3442_v0  ;;  %2933 = vtanh.f32 %v1825_v45 }
 0x794   : > { %v2704_v60 = vpop.f32.mrf.mxu1 }
 0x795   : > { %2935 = vtanh.f32 %v1820_v20  ;;  %v1835_v37 = vadd.f32 %v2704_v60, %v3446_v13 }
 0x796   : > { %v1829_v34 = vpop.f32.mrf.mxu1 }
 0x797   : > { %v1830_v38 = vadd.f32 %v1829_v34, %v3449_v24  ;;  %2937 = vtanh.f32 %v1835_v37 }
 0x798   : > { %v2729_v59 = vpop.f32.mrf.mxu1 }
 0x799   : > { %2939 = vtanh.f32 %v1830_v38  ;;  %v2039_v35 = vadd.f32 %v2729_v59, %v3344_v50 }
 0x79a   : > { %v2033_v39 = vpop.f32.mrf.mxu1 }
 0x79b   : > { %v2034_v47 = vadd.f32 %v2033_v39, %v3348_v54 }
 0x79c   : > { %v2732_v7 = vpop.f32.mrf.mxu1 }
 0x79d   : > { %v2049_v4 = vadd.f32 %v2732_v7, %v3339_v41 }
 0x79e   : > { %v2043_v11 = vpop.f32.mrf.mxu1 }
 0x79f   : > { %2941 = vtanh.f32 %v2049_v4  ;;  %v2044_v6 = vadd.f32 %v2043_v11, %v3341_v46 }
 0x7a0   : > { %v2934_v36 = vpop.eup %2933 }
 0x7a1   : > { %2943 = vtanh.f32 %v2044_v6  ;;  %v1843_v18 = vmul.f32 %v2934_v36, %v3458_v51 }
 0x7a2   : > { %v2936_v10 = vpop.eup %2935  ;;  %2945 = vtanh.f32 %v2039_v35 }
 0x7a3   : > { %v1842_v48 = vmul.f32 %v2936_v10, %v3455_v42  ;;  %2947 = vtanh.f32 %v2034_v47 }
 0x7a4   : > { %v2938_v49 = vpop.eup %2937 }
 0x7a5   : > { %v1846_v41 = vadd.f32 %v1843_v18, %v1842_v48  ;;  %v1845_v50 = vmul.f32 %v2938_v49, %v3466_v12 }
 0x7a6   : > { %v2940_v56 = vpop.eup %2939 }
 0x7a7   : > { %v1844_v61 = vmul.f32 %v2940_v56, %v3462_v2 }
 0x7a9   : > { %v1847_v16 = vadd.f32 %v1846_v41, %v1844_v61 }
 0x7ab   : > { %v1848_v46 = vadd.f32 %v1847_v16, %v1845_v50 }
 0x7ac   : > { %v2942_v62 = vpop.eup %2941 }
 0x7ad   : > { %v1849_v17 = vrot.slane %v1848_v46, 4  ;;  %2733 = vmatprep.subr.mxu0 %v2942_v62 }
 0x7ae   : > { %v2944_v54 = vpop.eup %2943  ;;  %2734 = vmatpush3.msra.mxu0 %v2942_v62 }
 0x7af   : > { %v1850_v3 = vadd.f32 %v1849_v17, %v1848_v46  ;;  %2735 = vmatprep.subr.mxu0 %v2944_v54  ;;  %v2946_v19 = vpop.eup %2945 }
 0x7b0   : > { %2736 = vmatpush3.msra.mxu0 %v2944_v54  ;;  %v2948_v8 = vpop.eup %2947 }
 0x7b1   : > { %v1851_v40 = vrot.slane %v1850_v3, 2  ;;  %2737 = vmatprep.subr.mxu0 %v2946_v19 }
 0x7b2   : > { %2738 = vmatpush3.msra.mxu0 %v2946_v19 }
 0x7b3   : > { %v1852_v14 = vadd.f32 %v1851_v40, %v1850_v3  ;;  %2739 = vmatprep.subr.mxu0 %v2948_v8 }
 0x7b4   : > { %2740 = vmatpush3.msra.mxu0 %v2948_v8 }
 0x7b5   : > { %v1853_v22 = vrot.slane %v1852_v14, 1  ;;  %2742 = vmatmul.mubr.msk.f32.vlgmr.msra.gmra.mxu0 %vm565_vm0, %v3358_v43 }
 0x7b6   : > { %2744 = vmatprep.mubr.msk.f32.mxu0 %vm565_vm0, %v3363_v58 }
 0x7b7   : > { %v1854_v25 = vadd.f32 %v1853_v22, %v1852_v14 }
 0x7b9   : > { %2745 = vmatmul.mubr.msk.f32.gmra.mxu0 %vm565_vm0, %v3372_v1  ;;  %v1855_v28 = vadd.f32 %v1854_v25, %v3479_v55 }
 0x7bb   : > { %2383 = vst [vmem:[%s3486_s25 + $0x2] sm:$0x1] %v1855_v28 }
 0x875   : > { %v2743_v29 = vpop.f32.mrf.mxu0 }
 0x876   : > { %v2128_v31 = vadd.f32 %v2743_v29, %v3398_v15 }
 0x877   : > { %v2122_v30 = vpop.f32.mrf.mxu0 }
 0x878   : > { %v2123_v58 = vadd.f32 %v2122_v30, %v3402_v26 }
 0x879   : > { %v2746_v21 = vpop.f32.mrf.mxu0 }
 0x87a   : > { %v2138_v27 = vadd.f32 %v2746_v21, %v3393_v5 }
 0x87b   : > { %v2132_v23 = vpop.f32.mrf.mxu0 }
 0x87c   : > { %2949 = vtanh.f32 %v2138_v27  ;;  %v2133_v43 = vadd.f32 %v2132_v23, %v3395_v9 }
 0x87e   : > { %2951 = vtanh.f32 %v2133_v43 }
 0x87f   : > { %2953 = vtanh.f32 %v2128_v31 }
 0x880   : > { %2955 = vtanh.f32 %v2123_v58 }
 0x889   : > { %v2950_v1 = vpop.eup %2949 }
 0x88a   : > { %2747 = vmatprep.subr.mxu1 %v2950_v1 }
 0x88b   : > { %v2952_v44 = vpop.eup %2951  ;;  %2748 = vmatpush3.msra.mxu1 %v2950_v1 }
 0x88c   : > { %2749 = vmatprep.subr.mxu1 %v2952_v44  ;;  %v2954_v32 = vpop.eup %2953 }
 0x88d   : > { %2750 = vmatpush3.msra.mxu1 %v2952_v44  ;;  %v2956_v5 = vpop.eup %2955 }
 0x88e   : > { %2751 = vmatprep.subr.mxu1 %v2954_v32 }
 0x88f   : > { %2752 = vmatpush3.msra.mxu1 %v2954_v32 }
 0x890   : > { %2753 = vmatprep.subr.mxu1 %v2956_v5 }
 0x891   : > { %2754 = vmatpush3.msra.mxu1 %v2956_v5 }
 0x892   : > { %2756 = vmatmul.mubr.msk.f32.vlgmr.msra.gmra.mxu1 %vm565_vm0, %v3412_v52 }
 0x893   : > { %2758 = vmatprep.mubr.msk.f32.mxu1 %vm565_vm0, %v3417_v53 }
 0x896   : > { %2759 = vmatmul.mubr.msk.f32.gmra.mxu1 %vm565_vm0, %v3426_v57 }
 0x952   : > { %v2757_v9 = vpop.f32.mrf.mxu1 }
 0x953   : > { %v2217_v15 = vadd.f32 %v2757_v9, %v3440_v63 }
 0x954   : > { %v2211_v26 = vpop.f32.mrf.mxu1 }
 0x955   : > { %v2212_v45 = vadd.f32 %v2211_v26, %v3442_v0  ;;  %2957 = vtanh.f32 %v2217_v15 }
 0x956   : > { %v2760_v33 = vpop.f32.mrf.mxu1 }
 0x957   : > { %2959 = vtanh.f32 %v2212_v45  ;;  %v2227_v20 = vadd.f32 %v2760_v33, %v3446_v13 }
 0x958   : > { %v2221_v60 = vpop.f32.mrf.mxu1 }
 0x959   : > { %v2222_v52 = vadd.f32 %v2221_v60, %v3449_v24  ;;  %2961 = vtanh.f32 %v2227_v20 }
 0x95b   : > { %2963 = vtanh.f32 %v2222_v52 }
 0x962   : > { %v2958_v53 = vpop.eup %2957 }
 0x963   : > { %v2235_v34 = vmul.f32 %v2958_v53, %v3458_v51 }
 0x964   : > { %v2960_v37 = vpop.eup %2959 }
 0x965   : > { %v2234_v57 = vmul.f32 %v2960_v37, %v3455_v42 }
 0x966   : > { %v2962_v63 = vpop.eup %2961 }
 0x967   : > { %v2238_v38 = vadd.f32 %v2235_v34, %v2234_v57  ;;  %v2237_v13 = vmul.f32 %v2962_v63, %v3466_v12 }
 0x968   : > { %v2964_v0 = vpop.eup %2963 }
 0x969   : > { %v2236_v59 = vmul.f32 %v2964_v0, %v3462_v2 }
 0x96b   : > { %v2239_v24 = vadd.f32 %v2238_v38, %v2236_v59 }
 0x96d   : > { %v2240_v39 = vadd.f32 %v2239_v24, %v2237_v13 }
 0x96f   : > { %v2241_v7 = vrot.slane %v2240_v39, 4 }
 0x971   : > { %v2242_v4 = vadd.f32 %v2241_v7, %v2240_v39 }
 0x973   : > { %v2243_v11 = vrot.slane %v2242_v4, 2 }
 0x975   : > { %v2244_v35 = vadd.f32 %v2243_v11, %v2242_v4 }
 0x977   : > { %v2245_v6 = vrot.slane %v2244_v35, 1 }
 0x979   : > { %v2246_v42 = vadd.f32 %v2245_v6, %v2244_v35 }
 0x97b   : > { %v2247_v51 = vadd.f32 %v2246_v42, %v3479_v55 }
 0x97d   : > { %2402 = vst [vmem:[%s3486_s25 + $0x3] sm:$0x1] %v2247_v51 }
 0x97e   : > { %2978 = shalt.err (!%p2975_p3)
}
 0x97f   : > { %s2979_s18 = scalar_lea.hbm %s3622_s21, 64  ;;  %s2983_s17 = scalar_lea.hbm %s3683_s13, 128 }
 0x980   : > { %p2980_p4 = scmp.ne.s32.totalorder %s3622_s21, %s2979_s18  ;;  %p2984_p9 = scmp.lt.s32.totalorder %s3622_s21, %s3683_s13 }
 0x981   : > { %p2985_p10 = scmp.lt.s32.totalorder %s2983_s17, %s2979_s18 }
 0x982   : > { %p2981_p7 = pnand %p2980_p4, %p3142_p5 }
 0x983   : > { %p2986_p11 = por %p2985_p10, %p2984_p9 }
 0x984   : > { %p2982_p8 = pneg %p2981_p7 }
 0x986   : > { %p2987_p12 = pnand %p2986_p11, %p2982_p8 }
 0x988   : > { %2990 = shalt.err (!%p2987_p12)
}
 0x989   : > { %s3029_s23 = smov 16   ;;  %s3030_s24 = smov 1  }
 0x98a   : > { %2761 = dma.vmem_to_hbm [thread:$0]  (%p3142_p5), %s3624_s14, 64, %s3622_s21, %s3630_s22, %s3029_s23, %s3029_s23, %s3030_s24  }
 0x98b PF: > { %p2767_p13 = scmp.ge.s32.totalorder %s3025_s30, 2  ;;  %s2279_s26 = sand.u32 1, %s3013_s27  }
 0x98c   : > { %s2280_s0 = scalar_lea.sflag [#allocation4], %s2279_s26 }
 0x98d   : > { %p2764_p0 = pnand %p2767_p13, %p3146_p6 }
 0x98f   : > { %p2765_p1 = pneg %p2764_p0 }
 0x991   : > { %3008 = dma.done.wait (%p2765_p1), %s2280_s0, 64  }
 0x992   : > { %3010 = vsyncadd (%p2765_p1), %s2280_s0, 4294967232  ;;  %s3689_s18 = sld [smem:[#allocation6_spill]]  ;;  %p25_p2 = scmp.ge.s32.totalorder %s3129_s15, 4  }
 0x993   : > { %s3690_s27 = smov %s3017_s28  ;;  %s3691_s28 = smov %s3021_s29 }
 0x994   : > { %s3693_s30 = smov %s3129_s15  ;;  %27 = sbr.rel (!%p25_p2) target bundleno = 6 (0x6), region = 113 }
 0x998   : > { %s3692_s29 = smov %s3689_s18 }
 0x999   :  { %2285 = vsyncpa [#allocation4], 1 }
 0x99a   :  { %2287 = vsyncpa [#allocation4 + $0x1], 1 }

</bundles_post_ra>
